<compile_context>
chip_gen: v7x
topology: tpu7x:2x2x1
jax: 0.10.0
libtpu: 0.0.40
codegen_flags: <defaults>
</compile_context>

<pallas_src>
import math
import functools

import jax
import jax.numpy as jnp
from jax import lax
from jax.experimental import pallas as pl
from jax.experimental.pallas import tpu as pltpu

IN_DIM = 32
OUT_DIM = 32
NUM_HEADS = 4
HEAD_DIM = OUT_DIM // NUM_HEADS
MAX_LEN = 8          # paper + conf + 6 authors
BATCH = 2


# ----------------------------------------------------------------------------
# One fused kernel for the whole forward pass
# ----------------------------------------------------------------------------
def _fused_forward_kernel(slen_ref, bias_ref,          # SMEM scalars
                          x_ref, temb_ref,
                          w1_ref, b1_ref, w2_ref, b2_ref,
                          cp_ref, ap_ref, eblw_ref, ebltw_ref,
                          wqkv_ref, bqkv_ref, wd_ref, bd_ref,
                          o_ref, *, B, L, D, H, HD):
    f32 = jnp.float32

    # -------- six fc_* MLPs fused into two matmuls ---------------------------
    # rows: [event (B*L rows) ; pos_event (B*L rows)], features IN_DIM
    x = x_ref[...]                                                   # (2BL, IN)
    h = jnp.dot(x, w1_ref[...], preferred_element_type=f32) + b1_ref[...]
    # ELU(alpha=1); clamp before exp so the discarded branch never produces inf
    h = jnp.where(h > 0, h, jnp.exp(jnp.minimum(h, 0.0)) - 1.0)
    y = jnp.dot(h, w2_ref[...], preferred_element_type=f32) + b2_ref[...]  # (2BL, 3D)

    # pick the per-slot output block: slot 0 -> fc_paper cols, slot 1 -> fc_conf,
    # slots 2.. -> fc_author  (W2 is block-diagonal, W1/b packed lane-wise)
    y3 = y.reshape(2 * B, L, 3 * D)
    stacked = jnp.concatenate(
        [y3[:, 0:1, 0:D], y3[:, 1:2, D:2 * D], y3[:, 2:, 2 * D:3 * D]],
        axis=1)                                                      # (2B, L, D)
    event_e = stacked[0:B]                                           # fc(event)
    paper = event_e[:, 0, :]                                         # (B, D)

    # -------- Attention module, both events batched (2B rows) ----------------
    target = stacked[:, 0, :]                                        # (2B, D)
    context = stacked[:, 1:, :]                                      # (2B, L-1, D)
    conf_c = stacked[:, 1, :]                                        # (2B, D)
    author_c = stacked[:, 2:, :]                                     # (2B, L-2, D)

    conf_p = jnp.dot(conf_c, cp_ref[...], preferred_element_type=f32)
    auth_p = jnp.dot(author_c.reshape(2 * B * (L - 2), D), ap_ref[...],
                     preferred_element_type=f32).reshape(2 * B, L - 2, D)
    conf_coef = jnp.sum(conf_p * target, axis=-1, keepdims=True)     # (2B, 1)
    auth_coef = jnp.sum(auth_p * target[:, None, :], axis=-1)        # (2B, L-2)
    coef = jnp.concatenate([conf_coef, auth_coef], axis=1)           # (2B, L-1)

    att = jnp.where(coef > 0, coef, 0.01 * coef)                     # LeakyReLU
    att = att - jnp.max(att, axis=1, keepdims=True)                  # softmax(dim=1)
    ea = jnp.exp(att)
    att = ea * pl.reciprocal(jnp.sum(ea, axis=1, keepdims=True), approx=True)

    aggre = jnp.sum(att[:, :, None] * context, axis=1)               # (2B, D)
    cur = jnp.concatenate([aggre, target], axis=1)                   # (2B, 2D)
    ev_agg = cur[0:B]
    pos_agg = cur[B:2 * B]

    # ebl bilinear: ebl(pos_event_att, event_att)
    pos_inter = jnp.sum(jnp.dot(pos_agg, eblw_ref[...], preferred_element_type=f32)
                        * ev_agg, axis=-1, keepdims=True) + bias_ref[0]   # (B,1)

    # -------- multi-head self-attention + maxpool -----------------------------
    S = L - 1
    hs = event_e[:, 1:, :] + temb_ref[...]                           # (B, S, D)
    qkv = jnp.dot(hs.reshape(B * S, D), wqkv_ref[...],
                  preferred_element_type=f32) + bqkv_ref[...]        # (B*S, 3D)
    q = qkv[:, 0:D].reshape(B, S, D)
    k = qkv[:, D:2 * D].reshape(B, S, D)
    v = qkv[:, 2 * D:3 * D].reshape(B, S, D)

    # stack heads along the batch axis -> one batched contraction for all heads
    qh = jnp.concatenate([q[:, :, i * HD:(i + 1) * HD] for i in range(H)], axis=0)
    kh = jnp.concatenate([k[:, :, i * HD:(i + 1) * HD] for i in range(H)], axis=0)
    vh = jnp.concatenate([v[:, :, i * HD:(i + 1) * HD] for i in range(H)], axis=0)

    sc = jnp.einsum('bqe,bke->bqk', qh, kh,
                    preferred_element_type=f32) * (1.0 / math.sqrt(HD))
    sc = sc - jnp.max(sc, axis=-1, keepdims=True)
    p = jnp.exp(sc)
    p = p * pl.reciprocal(jnp.sum(p, axis=-1, keepdims=True), approx=True)
    ctxh = jnp.einsum('bqk,bke->bqe', p, vh, preferred_element_type=f32)  # (H*B,S,HD)
    ctx = jnp.concatenate([ctxh[i * B:(i + 1) * B] for i in range(H)], axis=-1)

    dense = jnp.dot(ctx.reshape(B * S, D), wd_ref[...],
                    preferred_element_type=f32) + bd_ref[...]
    pooled = jnp.max(dense.reshape(B, S, D), axis=1)                  # maxpool (B,D)

    # ebl_t bilinear: ebl_t(pooled_context, paper)
    pos_t = jnp.sum(jnp.dot(pooled, ebltw_ref[...], preferred_element_type=f32)
                    * paper, axis=-1, keepdims=True) + bias_ref[1]    # (B,1)

    # -------- intra-event normalized similarity, masked min -------------------
    pe = event_e                                                      # (B, L, D)
    inv_nrm = lax.rsqrt(jnp.sum(pe * pe, axis=-1, keepdims=True) + 1e-12)
    en = pe * inv_nrm
    mm = jnp.einsum('bld,bkd->blk', en, en, preferred_element_type=f32)  # (B,L,L)

    row = lax.broadcasted_iota(jnp.int32, (L, L), 0)
    col = lax.broadcasted_iota(jnp.int32, (L, L), 1)
    eye = row == col

    # pack the three scores into one lane-dense output slab
    lane = lax.broadcasted_iota(jnp.int32, (B, 128), 1)
    brow = lax.broadcasted_iota(jnp.int32, (B, 128), 0)
    out = jnp.where(lane == 0, pos_t, 0.0)
    out = jnp.where(lane == 2, pos_inter, out)
    for b in range(B):                                  # B is tiny & static
        sl = slen_ref[b]                                # scalar from SMEM
        mb = jnp.where(eye, 1e6, mm[b])                 # (1-I)*M + 1e6*I
        valid = (row < sl) & (col < sl)
        mn = jnp.min(jnp.where(valid, mb, jnp.inf))     # scalar min over valid block
        out = jnp.where((lane == 1) & (brow == b), mn, out)

    o_ref[...] = out


# ----------------------------------------------------------------------------
# Model forward (is_test=True branch) -- single fused pallas_call
# ----------------------------------------------------------------------------
def model_forward_test(params, event, pos_event, entity_type, sample_len):
    B, L, Din = event.shape
    D = OUT_DIM

    fp, fc_, fa = params["fc_paper"], params["fc_conf"], params["fc_author"]
    # pack the three MLPs: W1 lane-wise, W2 block-diagonal
    w1c = jnp.concatenate([fp["w1"], fc_["w1"], fa["w1"]], axis=1)        # (IN, 3D)
    b1c = jnp.concatenate([fp["b1"], fc_["b1"], fa["b1"]], axis=1)        # (1, 3D)
    z = jnp.zeros((D, D), jnp.float32)
    w2bd = jnp.concatenate([
        jnp.concatenate([fp["w2"], z, z], axis=1),
        jnp.concatenate([z, fc_["w2"], z], axis=1),
        jnp.concatenate([z, z, fa["w2"]], axis=1)], axis=0)               # (3D, 3D)
    b2c = jnp.concatenate([fp["b2"], fc_["b2"], fa["b2"]], axis=1)        # (1, 3D)

    sa = params["selfatt"]
    wqkv = jnp.concatenate([sa["wq"], sa["wk"], sa["wv"]], axis=1)        # (D, 3D)
    bqkv = jnp.concatenate([sa["bq"], sa["bk"], sa["bv"]], axis=1)        # (1, 3D)

    # rows: event first, then pos_event
    x_all = jnp.concatenate([event.reshape(B * L, Din),
                             pos_event.reshape(B * L, Din)], axis=0)      # (2BL, IN)
    temb = params["type_emb"][entity_type]                                # (B, L-1, D)

    bias2 = jnp.concatenate([params["ebl_b"].reshape(1),
                             params["eblt_b"].reshape(1)], axis=0)        # (2,)
    slen = sample_len.astype(jnp.int32)                                   # (B,)

    kern = functools.partial(_fused_forward_kernel,
                             B=B, L=L, D=D, H=NUM_HEADS, HD=HEAD_DIM)

    # TODO(synk): for large batch on v7x, add a batch grid axis with
    # dimension_semantics=("parallel",) so both TensorCores are used; at B=2
    # a single grid-less invocation is optimal.
    out = pl.pallas_call(
        kern,
        out_shape=jax.ShapeDtypeStruct((B, 128), jnp.float32),
        in_specs=[pl.BlockSpec(memory_space=pltpu.MemorySpace.SMEM),      # sample_len
                  pl.BlockSpec(memory_space=pltpu.MemorySpace.SMEM)]      # biases
                 + [pl.BlockSpec(memory_space=pltpu.MemorySpace.VMEM)] * 14,
        out_specs=pl.BlockSpec(memory_space=pltpu.MemorySpace.VMEM),
    )(slen, bias2, x_all, temb, w1c, b1c, w2bd, b2c,
      params["cp_bilinear"], params["ap_bilinear"],
      params["ebl_w"], params["eblt_w"],
      wqkv, bqkv, sa["wd"], sa["bd"])

    pos_t = out[:, 0:1]        # intra_t_pos
    intra_pos = out[:, 1:2]    # intra_pos (masked min)
    pos_inter = out[:, 2:3]    # inter_pos
    return pos_t, intra_pos, pos_inter


# ----------------------------------------------------------------------------
# deterministic parameter initialization (mirrors the PyTorch inits)
# ----------------------------------------------------------------------------
def init_params(key):
    keys = iter(jax.random.split(key, 32))

    def xavier(k, shape, gain=1.414):
        fan_in, fan_out = shape
        std = gain * math.sqrt(2.0 / (fan_in + fan_out))
        return (std * jax.random.normal(k, shape)).astype(jnp.float32)

    def linear(k, din, dout, gain=1.414):
        kw, kb = jax.random.split(k)
        w = xavier(kw, (din, dout), gain)                # stored (in, out)
        bb = (0.01 * jax.random.normal(kb, (1, dout))).astype(jnp.float32)
        return w, bb

    def mlp_params(k):
        k1, k2 = jax.random.split(k)
        w1, b1 = linear(k1, IN_DIM, OUT_DIM)
        w2, b2 = linear(k2, OUT_DIM, OUT_DIM)
        return dict(w1=w1, b1=b1, w2=w2, b2=b2)

    params = {}
    params["fc_paper"] = mlp_params(next(keys))
    params["fc_conf"] = mlp_params(next(keys))
    params["fc_author"] = mlp_params(next(keys))
    params["cp_bilinear"] = xavier(next(keys), (OUT_DIM, OUT_DIM))
    params["ap_bilinear"] = xavier(next(keys), (OUT_DIM, OUT_DIM))
    params["ebl_w"] = xavier(next(keys), (2 * OUT_DIM, 2 * OUT_DIM), 1.0)
    params["ebl_b"] = (0.01 * jax.random.normal(next(keys), (1, 1))).astype(jnp.float32)
    params["eblt_w"] = xavier(next(keys), (OUT_DIM, OUT_DIM), 1.0)
    params["eblt_b"] = (0.01 * jax.random.normal(next(keys), (1, 1))).astype(jnp.float32)

    sa = {}
    for name in ("q", "k", "v", "d"):
        w, bb = linear(next(keys), OUT_DIM, OUT_DIM, 1.0)
        sa["w" + name] = w
        sa["b" + name] = bb
    params["selfatt"] = sa

    te = (0.1 * jax.random.normal(next(keys), (3, OUT_DIM))).astype(jnp.float32)
    params["type_emb"] = te.at[0].set(0.0)               # padding_idx=0
    return params


if __name__ == "__main__":
    key = jax.random.PRNGKey(0)
    kp, ke, kpe, kt = jax.random.split(key, 4)
    params = init_params(kp)

    event = jax.random.normal(ke, (BATCH, MAX_LEN, IN_DIM), jnp.float32)
    pos_event = jax.random.normal(kpe, (BATCH, MAX_LEN, IN_DIM), jnp.float32)
    entity_type = jax.random.randint(kt, (BATCH, MAX_LEN - 1), 0, 3, dtype=jnp.int32)
    sample_len = jnp.array([MAX_LEN, 5], dtype=jnp.int32)

    outs = jax.jit(model_forward_test)(params, event, pos_event, entity_type, sample_len)
    outs = jax.block_until_ready(outs)
    pos_t, intra_pos, pos_inter = outs
    assert pos_t.shape == (BATCH, 1)
    assert intra_pos.shape == (BATCH, 1)
    assert pos_inter.shape == (BATCH, 1)
    print("KERNEL_OK")
</pallas_src>

<mosaic_0001>
module attributes {stable_mosaic.version = 11 : i64} {
  func.func @_fused_forward_kernel(%arg0: memref<2xi32, #tpu.memory_space<smem>>, %arg1: memref<2xf32, #tpu.memory_space<smem>>, %arg2: memref<32x32xf32, #tpu.memory_space<vmem>>, %arg3: memref<2x7x32xf32, #tpu.memory_space<vmem>>, %arg4: memref<32x96xf32, #tpu.memory_space<vmem>>, %arg5: memref<1x96xf32, #tpu.memory_space<vmem>>, %arg6: memref<96x96xf32, #tpu.memory_space<vmem>>, %arg7: memref<1x96xf32, #tpu.memory_space<vmem>>, %arg8: memref<32x32xf32, #tpu.memory_space<vmem>>, %arg9: memref<32x32xf32, #tpu.memory_space<vmem>>, %arg10: memref<64x64xf32, #tpu.memory_space<vmem>>, %arg11: memref<32x32xf32, #tpu.memory_space<vmem>>, %arg12: memref<32x96xf32, #tpu.memory_space<vmem>>, %arg13: memref<1x96xf32, #tpu.memory_space<vmem>>, %arg14: memref<32x32xf32, #tpu.memory_space<vmem>>, %arg15: memref<1x32xf32, #tpu.memory_space<vmem>>, %arg16: memref<2x128xf32, #tpu.memory_space<vmem>>) attributes {dimension_semantics = [], scalar_prefetch = 0 : i64, scratch_operands = 0 : i64, tpu.core_type = #tpu.core_type<tc>} {
    %c0 = arith.constant 0 : index
    %c0_0 = arith.constant 0 : index
    %0 = vector.load %arg2[%c0, %c0_0] : memref<32x32xf32, #tpu.memory_space<vmem>>, vector<32x32xf32>
    %c0_1 = arith.constant 0 : index
    %c0_2 = arith.constant 0 : index
    %1 = vector.load %arg4[%c0_1, %c0_2] : memref<32x96xf32, #tpu.memory_space<vmem>>, vector<32x96xf32>
    %cst = arith.constant dense<0.000000e+00> : vector<32x96xf32>
    %2 = tpu.matmul %0, %1, %cst {dimension_numbers = #tpu.dot_dimension_numbers<[1], [0], [0], [1], [0, 0, 1, 1], [], []>} : vector<32x32xf32>, vector<32x96xf32>, vector<32x96xf32> -> vector<32x96xf32>
    %c0_3 = arith.constant 0 : index
    %c0_4 = arith.constant 0 : index
    %3 = vector.load %arg5[%c0_3, %c0_4] : memref<1x96xf32, #tpu.memory_space<vmem>>, vector<1x96xf32>
    %4 = vector.broadcast %3 : vector<1x96xf32> to vector<32x96xf32>
    %5 = arith.addf %2, %4 : vector<32x96xf32>
    %cst_5 = arith.constant 0.000000e+00 : f32
    %6 = vector.broadcast %cst_5 : f32 to vector<32x96xf32>
    %7 = arith.cmpf ogt, %5, %6 : vector<32x96xf32>
    %cst_6 = arith.constant 0.000000e+00 : f32
    %8 = vector.broadcast %cst_6 : f32 to vector<32x96xf32>
    %9 = arith.minimumf %5, %8 : vector<32x96xf32>
    %10 = math.exp %9 : vector<32x96xf32>
    %cst_7 = arith.constant 1.000000e+00 : f32
    %11 = vector.broadcast %cst_7 : f32 to vector<32x96xf32>
    %12 = arith.subf %10, %11 : vector<32x96xf32>
    %13 = arith.select %7, %5, %12 : vector<32x96xi1>, vector<32x96xf32>
    %c0_8 = arith.constant 0 : index
    %c0_9 = arith.constant 0 : index
    %14 = vector.load %arg6[%c0_8, %c0_9] : memref<96x96xf32, #tpu.memory_space<vmem>>, vector<96x96xf32>
    %cst_10 = arith.constant dense<0.000000e+00> : vector<32x96xf32>
    %15 = tpu.matmul %13, %14, %cst_10 {dimension_numbers = #tpu.dot_dimension_numbers<[1], [0], [0], [1], [0, 0, 1, 1], [], []>} : vector<32x96xf32>, vector<96x96xf32>, vector<32x96xf32> -> vector<32x96xf32>
    %c0_11 = arith.constant 0 : index
    %c0_12 = arith.constant 0 : index
    %16 = vector.load %arg7[%c0_11, %c0_12] : memref<1x96xf32, #tpu.memory_space<vmem>>, vector<1x96xf32>
    %17 = vector.broadcast %16 : vector<1x96xf32> to vector<32x96xf32>
    %18 = arith.addf %15, %17 : vector<32x96xf32>
    %19 = vector.shape_cast %18 : vector<32x96xf32> to vector<4x8x96xf32>
    %20 = vector.extract_strided_slice %19 {offsets = [0, 0, 0], sizes = [4, 1, 32], strides = [1, 1, 1]} : vector<4x8x96xf32> to vector<4x1x32xf32>
    %21 = vector.extract_strided_slice %19 {offsets = [0, 1, 32], sizes = [4, 1, 32], strides = [1, 1, 1]} : vector<4x8x96xf32> to vector<4x1x32xf32>
    %22 = vector.extract_strided_slice %19 {offsets = [0, 2, 64], sizes = [4, 6, 32], strides = [1, 1, 1]} : vector<4x8x96xf32> to vector<4x6x32xf32>
    %23 = tpu.concatenate %20, %21, %22 in 1 : vector<4x1x32xf32>, vector<4x1x32xf32>, vector<4x6x32xf32> -> vector<4x8x32xf32>
    %24 = vector.extract_strided_slice %23 {offsets = [0, 0, 0], sizes = [2, 8, 32], strides = [1, 1, 1]} : vector<4x8x32xf32> to vector<2x8x32xf32>
    %25 = vector.extract_strided_slice %24 {offsets = [0, 0, 0], sizes = [2, 1, 32], strides = [1, 1, 1]} : vector<2x8x32xf32> to vector<2x1x32xf32>
    %26 = vector.shape_cast %25 : vector<2x1x32xf32> to vector<2x32xf32>
    %27 = vector.extract_strided_slice %23 {offsets = [0, 0, 0], sizes = [4, 1, 32], strides = [1, 1, 1]} : vector<4x8x32xf32> to vector<4x1x32xf32>
    %28 = vector.shape_cast %27 : vector<4x1x32xf32> to vector<4x32xf32>
    %29 = vector.extract_strided_slice %23 {offsets = [0, 1, 0], sizes = [4, 7, 32], strides = [1, 1, 1]} : vector<4x8x32xf32> to vector<4x7x32xf32>
    %30 = vector.extract_strided_slice %23 {offsets = [0, 1, 0], sizes = [4, 1, 32], strides = [1, 1, 1]} : vector<4x8x32xf32> to vector<4x1x32xf32>
    %31 = vector.shape_cast %30 : vector<4x1x32xf32> to vector<4x32xf32>
    %32 = vector.extract_strided_slice %23 {offsets = [0, 2, 0], sizes = [4, 6, 32], strides = [1, 1, 1]} : vector<4x8x32xf32> to vector<4x6x32xf32>
    %c0_13 = arith.constant 0 : index
    %c0_14 = arith.constant 0 : index
    %33 = vector.load %arg8[%c0_13, %c0_14] : memref<32x32xf32, #tpu.memory_space<vmem>>, vector<32x32xf32>
    %cst_15 = arith.constant dense<0.000000e+00> : vector<4x32xf32>
    %34 = tpu.matmul %31, %33, %cst_15 {dimension_numbers = #tpu.dot_dimension_numbers<[1], [0], [0], [1], [0, 0, 1, 1], [], []>} : vector<4x32xf32>, vector<32x32xf32>, vector<4x32xf32> -> vector<4x32xf32>
    %35 = vector.shape_cast %32 : vector<4x6x32xf32> to vector<24x32xf32>
    %c0_16 = arith.constant 0 : index
    %c0_17 = arith.constant 0 : index
    %36 = vector.load %arg9[%c0_16, %c0_17] : memref<32x32xf32, #tpu.memory_space<vmem>>, vector<32x32xf32>
    %cst_18 = arith.constant dense<0.000000e+00> : vector<24x32xf32>
    %37 = tpu.matmul %35, %36, %cst_18 {dimension_numbers = #tpu.dot_dimension_numbers<[1], [0], [0], [1], [0, 0, 1, 1], [], []>} : vector<24x32xf32>, vector<32x32xf32>, vector<24x32xf32> -> vector<24x32xf32>
    %38 = vector.shape_cast %37 : vector<24x32xf32> to vector<4x6x32xf32>
    %39 = arith.mulf %34, %28 : vector<4x32xf32>
    %cst_19 = arith.constant dense<0.000000e+00> : vector<4xf32>
    %40 = vector.multi_reduction <add>, %39, %cst_19 [1] : vector<4x32xf32> to vector<4xf32>
    %41 = vector.shape_cast %40 : vector<4xf32> to vector<4x1xf32>
    %42 = vector.shape_cast %28 : vector<4x32xf32> to vector<4x1x32xf32>
    %43 = vector.broadcast %42 : vector<4x1x32xf32> to vector<4x6x32xf32>
    %44 = arith.mulf %38, %43 : vector<4x6x32xf32>
    %cst_20 = arith.constant dense<0.000000e+00> : vector<4x6xf32>
    %45 = vector.multi_reduction <add>, %44, %cst_20 [2] : vector<4x6x32xf32> to vector<4x6xf32>
    %46 = tpu.concatenate %41, %45 in 1 : vector<4x1xf32>, vector<4x6xf32> -> vector<4x7xf32>
    %cst_21 = arith.constant 0.000000e+00 : f32
    %47 = vector.broadcast %cst_21 : f32 to vector<4x7xf32>
    %48 = arith.cmpf ogt, %46, %47 : vector<4x7xf32>
    %cst_22 = arith.constant 0.00999999977 : f32
    %49 = vector.broadcast %cst_22 : f32 to vector<4x7xf32>
    %50 = arith.mulf %49, %46 : vector<4x7xf32>
    %51 = arith.select %48, %46, %50 : vector<4x7xi1>, vector<4x7xf32>
    %cst_23 = arith.constant dense<0xFF800000> : vector<4xf32>
    %52 = vector.multi_reduction <maximumf>, %51, %cst_23 [1] : vector<4x7xf32> to vector<4xf32>
    %53 = vector.shape_cast %52 : vector<4xf32> to vector<4x1xf32>
    %54 = vector.broadcast %53 : vector<4x1xf32> to vector<4x7xf32>
    %55 = arith.subf %51, %54 : vector<4x7xf32>
    %56 = math.exp %55 : vector<4x7xf32>
    %cst_24 = arith.constant dense<0.000000e+00> : vector<4xf32>
    %57 = vector.multi_reduction <add>, %56, %cst_24 [1] : vector<4x7xf32> to vector<4xf32>
    %58 = vector.shape_cast %57 : vector<4xf32> to vector<4x1xf32>
    %59 = tpu.reciprocal %58 {approx = true} : vector<4x1xf32> -> vector<4x1xf32>
    %60 = vector.broadcast %59 : vector<4x1xf32> to vector<4x7xf32>
    %61 = arith.mulf %56, %60 : vector<4x7xf32>
    %62 = vector.shape_cast %61 : vector<4x7xf32> to vector<4x7x1xf32>
    %63 = vector.broadcast %62 : vector<4x7x1xf32> to vector<4x7x32xf32>
    %64 = arith.mulf %63, %29 : vector<4x7x32xf32>
    %cst_25 = arith.constant dense<0.000000e+00> : vector<4x32xf32>
    %65 = vector.multi_reduction <add>, %64, %cst_25 [1] : vector<4x7x32xf32> to vector<4x32xf32>
    %66 = tpu.concatenate %65, %28 in 1 : vector<4x32xf32>, vector<4x32xf32> -> vector<4x64xf32>
    %67 = vector.extract_strided_slice %66 {offsets = [0, 0], sizes = [2, 64], strides = [1, 1]} : vector<4x64xf32> to vector<2x64xf32>
    %68 = vector.extract_strided_slice %66 {offsets = [2, 0], sizes = [2, 64], strides = [1, 1]} : vector<4x64xf32> to vector<2x64xf32>
    %c0_26 = arith.constant 0 : index
    %c0_27 = arith.constant 0 : index
    %69 = vector.load %arg10[%c0_26, %c0_27] : memref<64x64xf32, #tpu.memory_space<vmem>>, vector<64x64xf32>
    %cst_28 = arith.constant dense<0.000000e+00> : vector<2x64xf32>
    %70 = tpu.matmul %68, %69, %cst_28 {dimension_numbers = #tpu.dot_dimension_numbers<[1], [0], [0], [1], [0, 0, 1, 1], [], []>} : vector<2x64xf32>, vector<64x64xf32>, vector<2x64xf32> -> vector<2x64xf32>
    %71 = arith.mulf %70, %67 : vector<2x64xf32>
    %cst_29 = arith.constant dense<0.000000e+00> : vector<2xf32>
    %72 = vector.multi_reduction <add>, %71, %cst_29 [1] : vector<2x64xf32> to vector<2xf32>
    %73 = vector.shape_cast %72 : vector<2xf32> to vector<2x1xf32>
    %c0_30 = arith.constant 0 : index
    %74 = memref.load %arg1[%c0_30] : memref<2xf32, #tpu.memory_space<smem>>
    %75 = vector.broadcast %74 : f32 to vector<2x1xf32>
    %76 = arith.addf %73, %75 : vector<2x1xf32>
    %77 = vector.extract_strided_slice %24 {offsets = [0, 1, 0], sizes = [2, 7, 32], strides = [1, 1, 1]} : vector<2x8x32xf32> to vector<2x7x32xf32>
    %c0_31 = arith.constant 0 : index
    %c0_32 = arith.constant 0 : index
    %c0_33 = arith.constant 0 : index
    %78 = vector.load %arg3[%c0_31, %c0_32, %c0_33] : memref<2x7x32xf32, #tpu.memory_space<vmem>>, vector<2x7x32xf32>
    %79 = arith.addf %77, %78 : vector<2x7x32xf32>
    %80 = vector.shape_cast %79 : vector<2x7x32xf32> to vector<14x32xf32>
    %c0_34 = arith.constant 0 : index
    %c0_35 = arith.constant 0 : index
    %81 = vector.load %arg12[%c0_34, %c0_35] : memref<32x96xf32, #tpu.memory_space<vmem>>, vector<32x96xf32>
    %cst_36 = arith.constant dense<0.000000e+00> : vector<14x96xf32>
    %82 = tpu.matmul %80, %81, %cst_36 {dimension_numbers = #tpu.dot_dimension_numbers<[1], [0], [0], [1], [0, 0, 1, 1], [], []>} : vector<14x32xf32>, vector<32x96xf32>, vector<14x96xf32> -> vector<14x96xf32>
    %c0_37 = arith.constant 0 : index
    %c0_38 = arith.constant 0 : index
    %83 = vector.load %arg13[%c0_37, %c0_38] : memref<1x96xf32, #tpu.memory_space<vmem>>, vector<1x96xf32>
    %84 = vector.broadcast %83 : vector<1x96xf32> to vector<14x96xf32>
    %85 = arith.addf %82, %84 : vector<14x96xf32>
    %86 = vector.extract_strided_slice %85 {offsets = [0, 0], sizes = [14, 32], strides = [1, 1]} : vector<14x96xf32> to vector<14x32xf32>
    %87 = vector.shape_cast %86 : vector<14x32xf32> to vector<2x7x32xf32>
    %88 = vector.extract_strided_slice %85 {offsets = [0, 32], sizes = [14, 32], strides = [1, 1]} : vector<14x96xf32> to vector<14x32xf32>
    %89 = vector.shape_cast %88 : vector<14x32xf32> to vector<2x7x32xf32>
    %90 = vector.extract_strided_slice %85 {offsets = [0, 64], sizes = [14, 32], strides = [1, 1]} : vector<14x96xf32> to vector<14x32xf32>
    %91 = vector.shape_cast %90 : vector<14x32xf32> to vector<2x7x32xf32>
    %92 = vector.extract_strided_slice %87 {offsets = [0, 0, 0], sizes = [2, 7, 8], strides = [1, 1, 1]} : vector<2x7x32xf32> to vector<2x7x8xf32>
    %93 = vector.extract_strided_slice %87 {offsets = [0, 0, 8], sizes = [2, 7, 8], strides = [1, 1, 1]} : vector<2x7x32xf32> to vector<2x7x8xf32>
    %94 = vector.extract_strided_slice %87 {offsets = [0, 0, 16], sizes = [2, 7, 8], strides = [1, 1, 1]} : vector<2x7x32xf32> to vector<2x7x8xf32>
    %95 = vector.extract_strided_slice %87 {offsets = [0, 0, 24], sizes = [2, 7, 8], strides = [1, 1, 1]} : vector<2x7x32xf32> to vector<2x7x8xf32>
    %96 = tpu.concatenate %92, %93, %94, %95 in 0 : vector<2x7x8xf32>, vector<2x7x8xf32>, vector<2x7x8xf32>, vector<2x7x8xf32> -> vector<8x7x8xf32>
    %97 = vector.extract_strided_slice %89 {offsets = [0, 0, 0], sizes = [2, 7, 8], strides = [1, 1, 1]} : vector<2x7x32xf32> to vector<2x7x8xf32>
    %98 = vector.extract_strided_slice %89 {offsets = [0, 0, 8], sizes = [2, 7, 8], strides = [1, 1, 1]} : vector<2x7x32xf32> to vector<2x7x8xf32>
    %99 = vector.extract_strided_slice %89 {offsets = [0, 0, 16], sizes = [2, 7, 8], strides = [1, 1, 1]} : vector<2x7x32xf32> to vector<2x7x8xf32>
    %100 = vector.extract_strided_slice %89 {offsets = [0, 0, 24], sizes = [2, 7, 8], strides = [1, 1, 1]} : vector<2x7x32xf32> to vector<2x7x8xf32>
    %101 = tpu.concatenate %97, %98, %99, %100 in 0 : vector<2x7x8xf32>, vector<2x7x8xf32>, vector<2x7x8xf32>, vector<2x7x8xf32> -> vector<8x7x8xf32>
    %102 = vector.extract_strided_slice %91 {offsets = [0, 0, 0], sizes = [2, 7, 8], strides = [1, 1, 1]} : vector<2x7x32xf32> to vector<2x7x8xf32>
    %103 = vector.extract_strided_slice %91 {offsets = [0, 0, 8], sizes = [2, 7, 8], strides = [1, 1, 1]} : vector<2x7x32xf32> to vector<2x7x8xf32>
    %104 = vector.extract_strided_slice %91 {offsets = [0, 0, 16], sizes = [2, 7, 8], strides = [1, 1, 1]} : vector<2x7x32xf32> to vector<2x7x8xf32>
    %105 = vector.extract_strided_slice %91 {offsets = [0, 0, 24], sizes = [2, 7, 8], strides = [1, 1, 1]} : vector<2x7x32xf32> to vector<2x7x8xf32>
    %106 = tpu.concatenate %102, %103, %104, %105 in 0 : vector<2x7x8xf32>, vector<2x7x8xf32>, vector<2x7x8xf32>, vector<2x7x8xf32> -> vector<8x7x8xf32>
    "tpu.trace_start"() <{level = 10 : i32, message = "bqe,bke->bqk"}> : () -> ()
    %cst_39 = arith.constant dense<0.000000e+00> : vector<8x7x7xf32>
    %107 = tpu.matmul %96, %101, %cst_39 {dimension_numbers = #tpu.dot_dimension_numbers<[2], [2], [1], [1], [0, 0, 0, 1, 1, 1], [0], [0]>} : vector<8x7x8xf32>, vector<8x7x8xf32>, vector<8x7x7xf32> -> vector<8x7x7xf32>
    "tpu.trace_stop"() : () -> ()
    %cst_40 = arith.constant 0.353553385 : f32
    %108 = vector.broadcast %cst_40 : f32 to vector<8x7x7xf32>
    %109 = arith.mulf %107, %108 : vector<8x7x7xf32>
    %cst_41 = arith.constant dense<0xFF800000> : vector<8x7xf32>
    %110 = vector.multi_reduction <maximumf>, %109, %cst_41 [2] : vector<8x7x7xf32> to vector<8x7xf32>
    %111 = vector.shape_cast %110 : vector<8x7xf32> to vector<8x7x1xf32>
    %112 = vector.broadcast %111 : vector<8x7x1xf32> to vector<8x7x7xf32>
    %113 = arith.subf %109, %112 : vector<8x7x7xf32>
    %114 = math.exp %113 : vector<8x7x7xf32>
    %cst_42 = arith.constant dense<0.000000e+00> : vector<8x7xf32>
    %115 = vector.multi_reduction <add>, %114, %cst_42 [2] : vector<8x7x7xf32> to vector<8x7xf32>
    %116 = vector.shape_cast %115 : vector<8x7xf32> to vector<8x7x1xf32>
    %117 = tpu.reciprocal %116 {approx = true} : vector<8x7x1xf32> -> vector<8x7x1xf32>
    %118 = vector.broadcast %117 : vector<8x7x1xf32> to vector<8x7x7xf32>
    %119 = arith.mulf %114, %118 : vector<8x7x7xf32>
    "tpu.trace_start"() <{level = 10 : i32, message = "bqk,bke->bqe"}> : () -> ()
    %cst_43 = arith.constant dense<0.000000e+00> : vector<8x7x8xf32>
    %120 = tpu.matmul %119, %106, %cst_43 {dimension_numbers = #tpu.dot_dimension_numbers<[2], [1], [1], [2], [0, 0, 0, 1, 1, 2], [0], [0]>} : vector<8x7x7xf32>, vector<8x7x8xf32>, vector<8x7x8xf32> -> vector<8x7x8xf32>
    "tpu.trace_stop"() : () -> ()
    %121 = vector.extract_strided_slice %120 {offsets = [0, 0, 0], sizes = [2, 7, 8], strides = [1, 1, 1]} : vector<8x7x8xf32> to vector<2x7x8xf32>
    %122 = vector.extract_strided_slice %120 {offsets = [2, 0, 0], sizes = [2, 7, 8], strides = [1, 1, 1]} : vector<8x7x8xf32> to vector<2x7x8xf32>
    %123 = vector.extract_strided_slice %120 {offsets = [4, 0, 0], sizes = [2, 7, 8], strides = [1, 1, 1]} : vector<8x7x8xf32> to vector<2x7x8xf32>
    %124 = vector.extract_strided_slice %120 {offsets = [6, 0, 0], sizes = [2, 7, 8], strides = [1, 1, 1]} : vector<8x7x8xf32> to vector<2x7x8xf32>
    %125 = tpu.concatenate %121, %122, %123, %124 in 2 : vector<2x7x8xf32>, vector<2x7x8xf32>, vector<2x7x8xf32>, vector<2x7x8xf32> -> vector<2x7x32xf32>
    %126 = vector.shape_cast %125 : vector<2x7x32xf32> to vector<14x32xf32>
    %c0_44 = arith.constant 0 : index
    %c0_45 = arith.constant 0 : index
    %127 = vector.load %arg14[%c0_44, %c0_45] : memref<32x32xf32, #tpu.memory_space<vmem>>, vector<32x32xf32>
    %cst_46 = arith.constant dense<0.000000e+00> : vector<14x32xf32>
    %128 = tpu.matmul %126, %127, %cst_46 {dimension_numbers = #tpu.dot_dimension_numbers<[1], [0], [0], [1], [0, 0, 1, 1], [], []>} : vector<14x32xf32>, vector<32x32xf32>, vector<14x32xf32> -> vector<14x32xf32>
    %c0_47 = arith.constant 0 : index
    %c0_48 = arith.constant 0 : index
    %129 = vector.load %arg15[%c0_47, %c0_48] : memref<1x32xf32, #tpu.memory_space<vmem>>, vector<1x32xf32>
    %130 = vector.broadcast %129 : vector<1x32xf32> to vector<14x32xf32>
    %131 = arith.addf %128, %130 : vector<14x32xf32>
    %132 = vector.shape_cast %131 : vector<14x32xf32> to vector<2x7x32xf32>
    %cst_49 = arith.constant dense<0xFF800000> : vector<2x32xf32>
    %133 = vector.multi_reduction <maximumf>, %132, %cst_49 [1] : vector<2x7x32xf32> to vector<2x32xf32>
    %c0_50 = arith.constant 0 : index
    %c0_51 = arith.constant 0 : index
    %134 = vector.load %arg11[%c0_50, %c0_51] : memref<32x32xf32, #tpu.memory_space<vmem>>, vector<32x32xf32>
    %cst_52 = arith.constant dense<0.000000e+00> : vector<2x32xf32>
    %135 = tpu.matmul %133, %134, %cst_52 {dimension_numbers = #tpu.dot_dimension_numbers<[1], [0], [0], [1], [0, 0, 1, 1], [], []>} : vector<2x32xf32>, vector<32x32xf32>, vector<2x32xf32> -> vector<2x32xf32>
    %136 = arith.mulf %135, %26 : vector<2x32xf32>
    %cst_53 = arith.constant dense<0.000000e+00> : vector<2xf32>
    %137 = vector.multi_reduction <add>, %136, %cst_53 [1] : vector<2x32xf32> to vector<2xf32>
    %138 = vector.shape_cast %137 : vector<2xf32> to vector<2x1xf32>
    %c1 = arith.constant 1 : index
    %139 = memref.load %arg1[%c1] : memref<2xf32, #tpu.memory_space<smem>>
    %140 = vector.broadcast %139 : f32 to vector<2x1xf32>
    %141 = arith.addf %138, %140 : vector<2x1xf32>
    %142 = arith.mulf %24, %24 : vector<2x8x32xf32>
    %cst_54 = arith.constant dense<0.000000e+00> : vector<2x8xf32>
    %143 = vector.multi_reduction <add>, %142, %cst_54 [2] : vector<2x8x32xf32> to vector<2x8xf32>
    %144 = vector.shape_cast %143 : vector<2x8xf32> to vector<2x8x1xf32>
    %cst_55 = arith.constant 9.99999996E-13 : f32
    %145 = vector.broadcast %cst_55 : f32 to vector<2x8x1xf32>
    %146 = arith.addf %144, %145 : vector<2x8x1xf32>
    %147 = math.rsqrt %146 : vector<2x8x1xf32>
    %148 = vector.broadcast %147 : vector<2x8x1xf32> to vector<2x8x32xf32>
    %149 = arith.mulf %24, %148 : vector<2x8x32xf32>
    "tpu.trace_start"() <{level = 10 : i32, message = "bld,bkd->blk"}> : () -> ()
    %cst_56 = arith.constant dense<0.000000e+00> : vector<2x8x8xf32>
    %150 = tpu.matmul %149, %149, %cst_56 {dimension_numbers = #tpu.dot_dimension_numbers<[2], [2], [1], [1], [0, 0, 0, 1, 1, 1], [0], [0]>} : vector<2x8x32xf32>, vector<2x8x32xf32>, vector<2x8x8xf32> -> vector<2x8x8xf32>
    "tpu.trace_stop"() : () -> ()
    %151 = tpu.iota {dimensions = array<i32: 0>} : vector<8x8xi32>
    %152 = tpu.iota {dimensions = array<i32: 1>} : vector<8x8xi32>
    %153 = arith.cmpi eq, %151, %152 : vector<8x8xi32>
    %154 = tpu.iota {dimensions = array<i32: 1>} : vector<2x128xi32>
    %155 = tpu.iota {dimensions = array<i32: 0>} : vector<2x128xi32>
    %c0_i32 = arith.constant 0 : i32
    %156 = vector.broadcast %c0_i32 : i32 to vector<2x128xi32>
    %157 = arith.cmpi eq, %154, %156 : vector<2x128xi32>
    %cst_57 = arith.constant 0.000000e+00 : f32
    %158 = vector.shape_cast %141 : vector<2x1xf32> to vector<2x1xf32>
    %159 = vector.broadcast %158 : vector<2x1xf32> to vector<2x128xf32>
    %160 = vector.broadcast %cst_57 : f32 to vector<2x128xf32>
    %161 = arith.select %157, %159, %160 : vector<2x128xi1>, vector<2x128xf32>
    %c2_i32 = arith.constant 2 : i32
    %162 = vector.broadcast %c2_i32 : i32 to vector<2x128xi32>
    %163 = arith.cmpi eq, %154, %162 : vector<2x128xi32>
    %164 = vector.shape_cast %76 : vector<2x1xf32> to vector<2x1xf32>
    %165 = vector.broadcast %164 : vector<2x1xf32> to vector<2x128xf32>
    %166 = arith.select %163, %165, %161 : vector<2x128xi1>, vector<2x128xf32>
    %c0_58 = arith.constant 0 : index
    %167 = memref.load %arg0[%c0_58] : memref<2xi32, #tpu.memory_space<smem>>
    %168 = vector.extract_strided_slice %150 {offsets = [0, 0, 0], sizes = [1, 8, 8], strides = [1, 1, 1]} : vector<2x8x8xf32> to vector<1x8x8xf32>
    %169 = vector.shape_cast %168 : vector<1x8x8xf32> to vector<8x8xf32>
    %cst_59 = arith.constant 1.000000e+06 : f32
    %170 = vector.broadcast %cst_59 : f32 to vector<8x8xf32>
    %171 = arith.select %153, %170, %169 : vector<8x8xi1>, vector<8x8xf32>
    %172 = vector.broadcast %167 : i32 to vector<8x8xi32>
    %173 = arith.cmpi slt, %151, %172 : vector<8x8xi32>
    %174 = vector.broadcast %167 : i32 to vector<8x8xi32>
    %175 = arith.cmpi slt, %152, %174 : vector<8x8xi32>
    %176 = arith.andi %173, %175 : vector<8x8xi1>
    %cst_60 = arith.constant 0x7F800000 : f32
    %177 = vector.broadcast %cst_60 : f32 to vector<8x8xf32>
    %178 = arith.select %176, %171, %177 : vector<8x8xi1>, vector<8x8xf32>
    %179 = vector.shape_cast %178 : vector<8x8xf32> to vector<1x8x8xf32>
    %cst_61 = arith.constant dense<0x7F800000> : vector<1xf32>
    %180 = vector.multi_reduction <minimumf>, %179, %cst_61 [1, 2] : vector<1x8x8xf32> to vector<1xf32>
    %181 = vector.shape_cast %180 : vector<1xf32> to vector<1x1x1xf32>
    %182 = vector.extract %181[0, 0, 0] : f32 from vector<1x1x1xf32>
    %c1_i32 = arith.constant 1 : i32
    %183 = vector.broadcast %c1_i32 : i32 to vector<2x128xi32>
    %184 = arith.cmpi eq, %154, %183 : vector<2x128xi32>
    %c0_i32_62 = arith.constant 0 : i32
    %185 = vector.broadcast %c0_i32_62 : i32 to vector<2x128xi32>
    %186 = arith.cmpi eq, %155, %185 : vector<2x128xi32>
    %187 = arith.andi %184, %186 : vector<2x128xi1>
    %188 = vector.broadcast %182 : f32 to vector<2x128xf32>
    %189 = arith.select %187, %188, %166 : vector<2x128xi1>, vector<2x128xf32>
    %c1_63 = arith.constant 1 : index
    %190 = memref.load %arg0[%c1_63] : memref<2xi32, #tpu.memory_space<smem>>
    %191 = vector.extract_strided_slice %150 {offsets = [1, 0, 0], sizes = [1, 8, 8], strides = [1, 1, 1]} : vector<2x8x8xf32> to vector<1x8x8xf32>
    %192 = vector.shape_cast %191 : vector<1x8x8xf32> to vector<8x8xf32>
    %cst_64 = arith.constant 1.000000e+06 : f32
    %193 = vector.broadcast %cst_64 : f32 to vector<8x8xf32>
    %194 = arith.select %153, %193, %192 : vector<8x8xi1>, vector<8x8xf32>
    %195 = vector.broadcast %190 : i32 to vector<8x8xi32>
    %196 = arith.cmpi slt, %151, %195 : vector<8x8xi32>
    %197 = vector.broadcast %190 : i32 to vector<8x8xi32>
    %198 = arith.cmpi slt, %152, %197 : vector<8x8xi32>
    %199 = arith.andi %196, %198 : vector<8x8xi1>
    %cst_65 = arith.constant 0x7F800000 : f32
    %200 = vector.broadcast %cst_65 : f32 to vector<8x8xf32>
    %201 = arith.select %199, %194, %200 : vector<8x8xi1>, vector<8x8xf32>
    %202 = vector.shape_cast %201 : vector<8x8xf32> to vector<1x8x8xf32>
    %cst_66 = arith.constant dense<0x7F800000> : vector<1xf32>
    %203 = vector.multi_reduction <minimumf>, %202, %cst_66 [1, 2] : vector<1x8x8xf32> to vector<1xf32>
    %204 = vector.shape_cast %203 : vector<1xf32> to vector<1x1x1xf32>
    %205 = vector.extract %204[0, 0, 0] : f32 from vector<1x1x1xf32>
    %c1_i32_67 = arith.constant 1 : i32
    %206 = vector.broadcast %c1_i32_67 : i32 to vector<2x128xi32>
    %207 = arith.cmpi eq, %154, %206 : vector<2x128xi32>
    %c1_i32_68 = arith.constant 1 : i32
    %208 = vector.broadcast %c1_i32_68 : i32 to vector<2x128xi32>
    %209 = arith.cmpi eq, %155, %208 : vector<2x128xi32>
    %210 = arith.andi %207, %209 : vector<2x128xi1>
    %211 = vector.broadcast %205 : f32 to vector<2x128xf32>
    %212 = arith.select %210, %211, %189 : vector<2x128xi1>, vector<2x128xf32>
    %c0_69 = arith.constant 0 : index
    %c0_70 = arith.constant 0 : index
    %213 = vector.load %arg16[%c0_69, %c0_70] : memref<2x128xf32, #tpu.memory_space<vmem>>, vector<2x128xf32>
    tpu.vector_store %arg16[%c0_69, %c0_70], %212 {strides = array<i32>} : memref<2x128xf32, #tpu.memory_space<vmem>>, vector<2x128xf32>,
    return
  }
}

</mosaic_0001>

<bundles_post_ra>
// kernel: model_forward_test.1
= control target key start
LH: loop header
LB: loop body
LE: loop exit
PB: predicated region body
PF: predicated region fallthrough
CT: control target
= control target key end

     0   :  { %s5790_s0 = inlined_call_operand.vmem [shape: s32[2], index: 0, kind: input, shape index: {}]   ;;  %s5791_s1 = inlined_call_operand.vmem [shape: f32[2], index: 1, kind: input, shape index: {}]   ;;  %s5792_s2 = inlined_call_operand.vmem [shape: f32[32,32], index: 2, kind: input, shape index: {}]   ;;  %s5793_s3 = inlined_call_operand.vmem [shape: f32[2,7,32], index: 3, kind: input, shape index: {}]   ;;  %s5794_s4 = inlined_call_operand.vmem [shape: f32[32,96], index: 4, kind: input, shape index: {}]   ;;  %s5795_s5 = inlined_call_operand.vmem [shape: f32[1,96], index: 5, kind: input, shape index: {}]   ;;  %s5796_s6 = inlined_call_operand.vmem [shape: f32[96,96], index: 6, kind: input, shape index: {}]   ;;  %s5797_s7 = inlined_call_operand.vmem [shape: f32[1,96], index: 7, kind: input, shape index: {}]   ;;  %s5798_s8 = inlined_call_operand.vmem [shape: f32[32,32], index: 8, kind: input, shape index: {}]   ;;  %s5799_s9 = inlined_call_operand.vmem [shape: f32[32,32], index: 9, kind: input, shape index: {}]   ;;  %s5800_s10 = inlined_call_operand.vmem [shape: f32[64,64], index: 10, kind: input, shape index: {}]   ;;  %s5801_s11 = inlined_call_operand.vmem [shape: f32[32,32], index: 11, kind: input, shape index: {}]   ;;  %s5802_s12 = inlined_call_operand.vmem [shape: f32[32,96], index: 12, kind: input, shape index: {}]   ;;  %s5803_s13 = inlined_call_operand.vmem [shape: f32[1,96], index: 13, kind: input, shape index: {}]   ;;  %s5804_s14 = inlined_call_operand.vmem [shape: f32[32,32], index: 14, kind: input, shape index: {}]   ;;  %s5805_s15 = inlined_call_operand.vmem [shape: f32[1,32], index: 15, kind: input, shape index: {}]   ;;  %s5806_s16 = inlined_call_operand.vmem [shape: f32[2,128], index: 16, kind: output, shape index: {}]  }
   0x1   :  { %5813 = sst [smem:[#allocation9_spill]] %s5790_s0 }
   0x2   :  { %21 = vsyncpa [#allocation3], 0  ;;  %s5814_s23 = sld [smem:[#allocation9_spill]] }
   0x8   :  { %s29_s24 = sshll.u32 %s5814_s23, 4  ;;  %s30_s24 = int_to_ptr.vmem [resolvable:$true] %s29_s24 }
   0x9   :  { %22 = vsyncpa [#allocation5], 0  ;;  %s39_s27 = sshll.u32 %s5791_s1, 4  ;;  %s4694_s28 = scalar_lea.vmem %s30_s24, 16  ;;  %s40_s27 = int_to_ptr.vmem [resolvable:$true] %s39_s27 }
   0xa   :  { %p4695_p0 = scmp.ne.s32.totalorder %s30_s24, %s4694_s28  ;;  %p4699_p1 = scmp.lt.s32.totalorder %s30_s24, %s30_s24 }
   0xb   :  { %p4700_p2 = scmp.lt.s32.totalorder %s4694_s28, %s4694_s28 }
   0xd   :  { %p4701_p3 = por %p4700_p2, %p4699_p1 }
   0xf   :  { %p4702_p4 = pnand %p4701_p3, %p4695_p0 }
  0x11   :  { %4705 = shalt.err (!%p4702_p4)
}
  0x12   :  { %s4722_s29 = smov [#allocation2]   ;;  %s4706_s30 = scalar_lea.vmem %s40_s27, 16 }
  0x13   :  { %32 = dma.vmem_to_smem %s30_s24, 16, %s4722_s29, [#allocation3]  }
  0x14   :  { %p4707_p5 = scmp.ne.s32.totalorder %s40_s27, %s4706_s30  ;;  %p4711_p6 = scmp.lt.s32.totalorder %s40_s27, %s40_s27 }
  0x15   :  { %p4712_p7 = scmp.lt.s32.totalorder %s4706_s30, %s4706_s30 }
  0x17   :  { %p4713_p8 = por %p4712_p7, %p4711_p6 }
  0x19   :  { %p4714_p9 = pnand %p4713_p8, %p4707_p5 }
  0x1b   :  { %4717 = shalt.err (!%p4714_p9)
}
  0x1c   :  { %s4723_s0 = smov [#allocation4]  }
  0x1d   :  { %42 = dma.vmem_to_smem %s40_s27, 16, %s4723_s0, [#allocation5]  }
  0x1e   :  { %4718 = dma.done.wait [#allocation3], 16  }
  0x1f   :  { %4719 = vsyncadd [#allocation3], 4294967280 }
  0x20   :  { %4720 = dma.done.wait [#allocation5], 16  }
  0x21   :  { %4721 = vsyncadd [#allocation5], 4294967280 }
  0x22   :  { %77 = sfence }
  0x23   :  { %v82_v0 = vld [vmem:[%s5794_s4] sm:$0xff]  ;;  %v83_v1 = vld [vmem:[%s5794_s4 + $0x8] sm:$0xff]  ;;  %v84_v2 = vld [vmem:[%s5794_s4 + $0x10] sm:$0xff]  ;;  %vm93_vm0 = vcmask 261120   ;;  %vm234_vm1 = vcmask 785408   ;;  %v5810_v61 = vmov 0.0|0.0  }
  0x24   :  { %v4548_v3 = vpack.c.bf16 %v83_v1, %v82_v0  ;;  %v85_v4 = vld [vmem:[%s5794_s4 + $0x18] sm:$0xff]  ;;  %v78_v5 = vld [vmem:[%s5792_s2] sm:$0xff]  ;;  %v216_v8 = vld [vmem:[%s5796_s6 + $0x8] sm:$0xff]  ;;  %vm4726_vm6 = vmmov 0   ;;  %vm360_vm7 = vcmask 1040384   ;;  %vm365_vm8 = vcmask 1041408  }
  0x25   :  { %v4552_v6 = vpack.c.bf16 %v85_v4, %v84_v2  ;;  %4342 = vmatprep.mubr.msk.f32.mxu0 %vm93_vm0, %v78_v5  ;;  %v215_v7 = vld [vmem:[%s5796_s6] sm:$0xff]  ;;  %v79_v10 = vld [vmem:[%s5792_s2 + $0x8] sm:$0xff]  ;;  %v80_v11 = vld [vmem:[%s5792_s2 + $0x10] sm:$0xff]  ;;  %vm379_vm9 = vcmask 1041409   ;;  %vm382_vm10 = vcmask 1042434   ;;  %vm385_vm11 = vcmask 1043459  }
  0x26   :  { %4549 = vmatprep.subr.bf16.mxu0 %v4548_v3  ;;  %v4556_v9 = vpack.c.bf16 %v216_v8, %v215_v7  ;;  %v81_v12 = vld [vmem:[%s5792_s2 + $0x18] sm:$0xff]  ;;  %v217_v13 = vld [vmem:[%s5796_s6 + $0x10] sm:$0xff]  ;;  %v219_v16 = vld [vmem:[%s5796_s6 + $0x20] sm:$0xff]  ;;  %v5808_v8 = vmov 0.0   ;;  %vm934_vm12 = vcmask 259072   ;;  %vm742_vm13 = vcmask 257024  }
  0x27   :  { %4551 = vmatpush3.bf16.msra.mxu0 %v4548_v3  ;;  %v218_v14 = vld [vmem:[%s5796_s6 + $0x18] sm:$0xff]  ;;  %v220_v17 = vld [vmem:[%s5796_s6 + $0x28] sm:$0xff]  ;;  %v221_v19 = vld [vmem:[%s5796_s6 + $0x30] sm:$0xff]  ;;  %s4731_s29 = smov 120   ;;  %s4733_s4 = smov 104   ;;  %vm974_vm14 = vcmask 7168  }
  0x28   :  { %4553 = vmatprep.subr.bf16.mxu0 %v4552_v6  ;;  %4557 = vmatprep.subr.bf16.mxu1 %v4556_v9  ;;  %v4560_v15 = vpack.c.bf16 %v218_v14, %v217_v13  ;;  %v4564_v18 = vpack.c.bf16 %v220_v17, %v219_v16  ;;  %v222_v20 = vld [vmem:[%s5796_s6 + $0x38] sm:$0xff]  ;;  %v223_v22 = vld [vmem:[%s5796_s6 + $0x40] sm:$0xff]  ;;  %v224_v23 = vld [vmem:[%s5796_s6 + $0x48] sm:$0xff]  ;;  %v4729_v16 = vmov 1983009808   ;;  %s4734_s22 = smov 32  }
  0x29   :  { %4559 = vmatpush3.bf16.msra.mxu1 %v4556_v9  ;;  %v4568_v21 = vpack.c.bf16 %v222_v20, %v221_v19  ;;  %v225_v24 = vld [vmem:[%s5796_s6 + $0x50] sm:$0xff]  ;;  %v4572_v25 = vpack.c.bf16 %v224_v23, %v223_v22  ;;  %v226_v26 = vld [vmem:[%s5796_s6 + $0x58] sm:$0xff]  ;;  %v4165_v28 = vld [vmem:[%s5795_s5] ss:$0 sm:$0xff]  ;;  %v461_v17 = vunpack.c.l.s4 %v4729_v16  ;;  %v4730_v19 = vmov 1966171168  }
  0x2a   :  { %4561 = vmatprep.subr.bf16.mxu1 %v4560_v15  ;;  %v4576_v27 = vpack.c.bf16 %v226_v26, %v225_v24  ;;  %v370_v57 = vld [vmem:[%s5798_s8] sm:$0xff]  ;;  %v371_v58 = vld [vmem:[%s5798_s8 + $0x8] sm:$0xff]  ;;  %v372_v63 = vld [vmem:[%s5798_s8 + $0x10] sm:$0xff]  ;;  %v1176_v20 = vunpack.c.l.s4 %v4730_v19  ;;  %s4230_s5 = sld [smem:[#allocation4 + $0x1]]  ;;  %s1159_s6 = sld [smem:[#allocation4]] }
  0x2b   :  { %4555 = vmatpush3.bf16.msra.mxu0 %v4552_v6  ;;  %v4581_v59 = vpack.c.bf16 %v371_v58, %v370_v57  ;;  %v4174_v60 = vld [vmem:[%s5797_s7] ss:$0 sm:$0xff]  ;;  %v373_v0 = vld [vmem:[%s5798_s8 + $0x18] sm:$0xff]  ;;  %s4725_s7 = smov 96   ;;  %s4728_s8 = smov 64   ;;  %v1274_v13 = vld [vmem:[%s5802_s12 + $0x10] sm:$0xff] }
  0x2c   :  { %4580 = vmatprep.subr.bf16.mxu0 %v5810_v61  ;;  %v4584_v3 = vpack.c.bf16 %v373_v0, %v372_v63  ;;  %v1275_v14 = vld [vmem:[%s5802_s12 + $0x18] sm:$0xff]  ;;  %v1162_v23 = vld [vmem:[%s5793_s3] sm:$0x7f] }
  0x2d   :  { %4563 = vmatpush3.bf16.msra.mxu1 %v4560_v15  ;;  %v4608_v15 = vpack.c.bf16 %v1275_v14, %v1274_v13  ;;  %v529_v13 = vld [vmem:[%s5799_s9 + $0x10] sm:$0xff]  ;;  %v530_v14 = vld [vmem:[%s5799_s9 + $0x18] sm:$0xff] }
  0x2e   :  { %4343 = vmatmul.mubr.msk.f32.vlgmr.msra.gmra.mrb[0].mxu0 %vm93_vm0, %v79_v10  ;;  %4565 = vmatprep.subr.bf16.mxu1 %v4564_v18  ;;  %v1272_v10 = vld [vmem:[%s5802_s12] sm:$0xff] }
  0x2f   :  { %4345 = vmatprep.mubr.msk.f32.mxu0 %vm93_vm0, %v80_v11  ;;  %4582 = vmatpush3.bf16.msra.mxu0 %v4581_v59  ;;  %v1273_v11 = vld [vmem:[%s5802_s12 + $0x8] sm:$0xff] }
  0x30   :  { %4583 = vmatprep.subr.bf16.mxu0 %v5810_v61 }
  0x31   :  { %4567 = vmatpush3.bf16.msra.mxu1 %v4564_v18  ;;  %v463_v18 = vlaneseq }
  0x32   :  { %4346 = vmatmul.mubr.msk.f32.gmra.mrb[2].mxu0 %vm93_vm0, %v81_v12  ;;  %4569 = vmatprep.subr.bf16.mxu1 %v4568_v21  ;;  %v4604_v12 = vpack.c.bf16 %v1273_v11, %v1272_v10 }
  0x33   :  { %4585 = vmatpush3.bf16.msra.mxu0 %v4584_v3  ;;  %4386 = vmatprep.mubr.msk.f32.mxu0 %vm4726_vm6, %v5808_v8  ;;  %v4946_v22 = vshrl.u32 %v463_v18, 7 }
  0x34   :  { %4586 = vmatprep.subr.bf16.mxu0 %v5810_v61 }
  0x35   :  { %4571 = vmatpush3.bf16.msra.mxu1 %v4568_v21  ;;  %v462_v21 = vunpack.c.0.s8 %v461_v17 }
  0x36   :  { %4573 = vmatprep.subr.bf16.mxu1 %v4572_v25 }
  0x39   :  { %4575 = vmatpush3.bf16.msra.mxu1 %v4572_v25  ;;  %v1177_v25 = vunpack.c.0.s8 %v1176_v20 }
  0x3a   :  { %4577 = vmatprep.subr.bf16.mxu1 %v4576_v27 }
  0x3d   :  { %4579 = vmatpush3.bf16.msra.mxu1 %v4576_v27  ;;  %v1166_v27 = vrot.slane %v1162_v23, 7 }
  0x3e   :  { %4605 = vmatprep.subr.bf16.mxu1 %v4604_v12 }
 0x101   :  { %v4344_v29 = vpop.f32.mrb[0].mxu0 }
 0x102   :  { %v178_v30 = vadd.f32 %v4344_v29, %v4165_v28  ;;  %v172_v31 = vpop.f32.mrb[1].mxu0 }
 0x103   :  { %v173_v32 = vadd.f32 %v4165_v28, %v172_v31 }
 0x104   :  { %v196_v33 = vmin.f32 %v178_v30, 0.0  ;;  %vm192_vm3 = vcmp.gt.f32.partialorder %v178_v30, 0.0 }
 0x105   :  { %v195_v34 = vmin.f32 %v173_v32, 0.0  ;;  %v4347_v35 = vpop.f32.mrb[2].mxu0  ;;  %vm191_vm2 = vcmp.gt.f32.partialorder %v173_v32, 0.0 }
 0x106   :  { %v201_v36 = vmul.f32 1.442695, %v196_v33  ;;  %v188_v37 = vadd.f32 %v4347_v35, %v4165_v28  ;;  %v182_v38 = vpop.f32.mrb[3].mxu0 }
 0x107   :  { %v199_v39 = vmul.f32 1.442695, %v195_v34  ;;  %v183_v40 = vadd.f32 %v4165_v28, %v182_v38  ;;  %v4952_v28 = vsub.s32 %v462_v21, %v4946_v22  ;;  %v1163_v34 = vld [vmem:[%s5793_s3 + $0x8] sm:$0x7f] }
 0x108   :  { %4646 = vpow2.f32 %v201_v36  ;;  %v198_v41 = vmin.f32 %v188_v37, 0.0  ;;  %vm194_vm5 = vcmp.gt.f32.partialorder %v188_v37, 0.0  ;;  %v527_v36 = vld [vmem:[%s5799_s9] sm:$0xff] }
 0x109   :  { %4648 = vpow2.f32 %v199_v39  ;;  %v197_v42 = vmin.f32 %v183_v40, 0.0  ;;  %vm193_vm4 = vcmp.gt.f32.partialorder %v183_v40, 0.0 }
 0x10a   :  { %v205_v43 = vmul.f32 1.442695, %v198_v41 }
 0x10b   :  { %v203_v44 = vmul.f32 1.442695, %v197_v42 }
 0x10c   :  { %4650 = vpow2.f32 %v205_v43  ;;  %v1167_v43 = vrot.slane %v1163_v34, 7 }
 0x10d   :  { %4652 = vpow2.f32 %v203_v44 }
 0x112   :  { %v4647_v45 = vpop.eup %4646 }
 0x113   :  { %v4649_v46 = vpop.eup %4648  ;;  %v4171_v47 = vadd.f32 -1.0, %v4647_v45 }
 0x114   :  { %v4170_v48 = vadd.f32 -1.0, %v4649_v46 }
 0x115   :  { %v212_v52 = vsel %vm192_vm3, %v178_v30, %v4171_v47  ;;  %v4956_v30 = vsub.s32 %v1177_v25, %v4946_v22  ;;  %vm1683_vm3 = vcmask 64512  }
 0x116   :  { %v4651_v49 = vpop.eup %4650  ;;  %v211_v50 = vsel %vm191_vm2, %v173_v32, %v4170_v48  ;;  %vm1030_vm2 = vcmask 260096  }
 0x117   :  { %v4653_v51 = vpop.eup %4652  ;;  %4372 = vmatprep.mubr.msk.f32.mxu1 %vm234_vm1, %v211_v50  ;;  %v4173_v53 = vadd.f32 -1.0, %v4651_v49 }
 0x118   :  { %4373 = vmatmul.mubr.msk.f32.vlgmr.msra.gmra.mrb[0].mxu1 %vm234_vm1, %v212_v52  ;;  %v4172_v54 = vadd.f32 -1.0, %v4653_v51 }
 0x119   :  { %v214_v56 = vsel %vm194_vm5, %v188_v37, %v4173_v53  ;;  %4607 = vmatpush3.bf16.msra.mxu1 %v4604_v12  ;;  %v528_v37 = vld [vmem:[%s5799_s9 + $0x8] sm:$0xff]  ;;  %vm2634_vm5 = vcmask 55296  }
 0x11a   :  { %v213_v55 = vsel %vm193_vm4, %v183_v40, %v4172_v54  ;;  %4609 = vmatprep.subr.bf16.mxu1 %v4608_v15  ;;  %v4587_v46 = vpack.c.bf16 %v528_v37, %v527_v36  ;;  %vm1081_vm4 = vcmask 523264  }
 0x11b   :  { %4375 = vmatprep.mubr.msk.f32.mxu1 %vm234_vm1, %v213_v55 }
 0x11c   :  { %4376 = vmatmul.mubr.msk.f32.gmra.mrb[2].mxu1 %vm234_vm1, %v214_v56  ;;  %vm979_vm1 = vcmask 52224  }
 0x11d   :  { %4611 = vmatpush3.bf16.msra.mxu1 %v4608_v15 }
 0x11e   :  { %4436 = vmatprep.subr.mxu1 %v5808_v8 }
 0x1eb   :  { %v4374_v62 = vpop.f32.mrb[0].mxu1 }
 0x1ec   :  { %v4917_v1 = vadd.f32 %v4374_v62, %v4174_v60  ;;  %v313_v2 = vpop.f32.mrb[1].mxu1 }
 0x1ed   :  { %v314_v4 = vadd.f32 %v4174_v60, %v313_v2 }
 0x1ee   :  { %338 = vrot.lane.b32.xlu1 %v4917_v1, %s4725_s7 }
 0x1ef   :  { %v4377_v5 = vpop.f32.mrb[2].mxu1  ;;  %336 = vrot.lane.b32.xlu0 %v314_v4, %s4725_s7 }
 0x1f0   :  { %v329_v6 = vadd.f32 %v4377_v5, %v4174_v60  ;;  %v323_v7 = vpop.f32.mrb[3].mxu1 }
 0x1f1   :  { %v324_v9 = vadd.f32 %v4174_v60, %v323_v7 }
 0x1f2   :  { %348 = vrot.lane.b32.xlu1 %v314_v4, %s4728_s8 }
 0x1f3   :  { %342 = vrot.lane.b32.xlu0 %v329_v6, %s4725_s7 }
 0x1f6   :  { %352 = vrot.lane.b32.xlu1 %v324_v9, %s4728_s8 }
 0x1f7   :  { %340 = vrot.lane.b32.xlu0 %v324_v9, %s4725_s7 }
 0x1fa   :  { %354 = vrot.lane.b32.xlu1 %v329_v6, %s4728_s8 }
 0x1fb   :  { %350 = vrot.lane.b32.xlu0 %v4917_v1, %s4728_s8 }
 0x260   :  { %v339_v24 = vpop.permute.xlu1 %338 }
 0x261   :  { %v337_v26 = vpop.permute.xlu0 %336  ;;  %v362_v44 = vsel %vm360_vm7, %v4917_v1, %v339_v24 }
 0x262   :  { %v361_v29 = vsel %vm360_vm7, %v314_v4, %v337_v26  ;;  %v4590_v26 = vpack.c.bf16 %v530_v14, %v529_v13 }
 0x264   :  { %v349_v31 = vpop.permute.xlu1 %348 }
 0x265   :  { %v4959_v32 = vsel %vm365_vm8, %v361_v29, %v349_v31  ;;  %v343_v33 = vpop.permute.xlu0 %342 }
 0x266   :  { %v1170_v35 = vadd.f32 %v1166_v27, %v4959_v32  ;;  %v459_v38 = vcombine.high %v4959_v32, %v4959_v32  ;;  %v466_v39 = vrot.slane %v4959_v32, %v4952_v28  ;;  %v364_v47 = vsel %vm360_vm7, %v329_v6, %v343_v33 }
 0x267   :  { %v5807_v52 = vrot.slane %v4959_v32, 1 }
 0x268   :  { %v1174_v40 = vcombine.high %v1170_v35, %v1170_v35  ;;  %v1181_v41 = vrot.slane %v1170_v35, %v4956_v30  ;;  %v353_v42 = vpop.permute.xlu1 %352  ;;  %v473_v53 = vrot.slane %v459_v38, %v4952_v28  ;;  %v474_v54 = vcombine.high %v466_v39, %v466_v39 }
 0x269   :  { %v341_v45 = vpop.permute.xlu0 %340 }
 0x26a   :  { %v363_v48 = vsel %vm360_vm7, %v324_v9, %v341_v45  ;;  %v1188_v49 = vrot.slane %v1174_v40, %v4956_v30  ;;  %v1189_v50 = vcombine.high %v1181_v41, %v1181_v41  ;;  %v1197_v59 = vrot.slane %v1181_v41, %v4956_v30 }
 0x26b   :  { %v4982_v51 = vsel %vm365_vm8, %v363_v48, %v353_v42  ;;  %v531_v23 = vcombine.low %v474_v54, %v473_v53  ;;  %vm2729_vm7 = vcmask 1046528  }
 0x26c   :  { %v381_v55 = vrot.slane %v4982_v51, 7  ;;  %v493_v56 = vcombine.high %v4982_v51, %v4982_v51  ;;  %v500_v57 = vrot.slane %v4982_v51, %v4952_v28  ;;  %v355_v58 = vpop.permute.xlu1 %354  ;;  %v1190_v63 = vcombine.high %v1188_v49, %v1188_v49 }
 0x26d   :  { %v4993_v60 = vsel %vm365_vm8, %v364_v47, %v355_v58  ;;  %v351_v62 = vpop.permute.xlu0 %350  ;;  %v1204_v0 = vrot.slane %v1188_v49, %v4956_v30  ;;  %v1211_v1 = vrot.slane %v1189_v50, %v4956_v30  ;;  %v1219_v34 = vcombine.high %v1197_v59, %v1197_v59 }
 0x26e   :  { %v384_v2 = vrot.slane %v4993_v60, 6  ;;  %v510_v3 = vcombine.high %v4993_v60, %v4993_v60  ;;  %v517_v4 = vrot.slane %v4993_v60, %v4952_v28  ;;  %v5003_v5 = vsel %vm365_vm8, %v362_v44, %v351_v62 }
 0x26f   :  { %v1171_v6 = vadd.f32 %v1167_v43, %v5003_v5  ;;  %v380_v7 = vsel %vm379_vm9, %v5003_v5, %v5807_v52  ;;  %v483_v9 = vrot.slane %v5003_v5, %v4952_v28  ;;  %v476_v10 = vcombine.high %v5003_v5, %v5003_v5 }
 0x270   :  { %v524_v11 = vrot.slane %v510_v3, %v4952_v28  ;;  %v383_v12 = vsel %vm382_vm10, %v381_v55, %v380_v7  ;;  %v507_v15 = vrot.slane %v493_v56, %v4952_v28  ;;  %v508_v16 = vcombine.high %v500_v57, %v500_v57 }
 0x271   :  { %v1223_v17 = vcombine.high %v1171_v6, %v1171_v6  ;;  %v386_v19 = vsel %vm385_vm11, %v384_v2, %v383_v12  ;;  %v4180_v20 = vcombine.high %v473_v53, %v483_v9  ;;  %v490_v21 = vrot.slane %v476_v10, %v4952_v28 }
 0x272   :  { %4387 = vmatmul.mubr.msk.f32.vlgmr.msra.gmra.mrb[4].mxu0 %vm93_vm0, %v386_v19  ;;  %v526_v24 = vcombine.high %v524_v11, %v524_v11  ;;  %v549_v31 = vcombine.low %v508_v16, %v507_v15  ;;  %v4181_v33 = vcombine.high %v507_v15, %v517_v4  ;;  %v1218_v36 = vrot.slane %v1190_v63, %v4956_v30 }
 0x273   :  { %v1237_v25 = vrot.slane %v1223_v17, %v4956_v30  ;;  %4588 = vmatpush3.bf16.msra.mxu0 %v4587_v46  ;;  %4397 = vmatprep.mubr.msk.f32.mxu0 %vm4726_vm6, %v5808_v8  ;;  %v492_v27 = vcombine.high %v490_v21, %v490_v21  ;;  %v546_v29 = vrot.slane %v4180_v20, %v4952_v28  ;;  %v734_v42 = vrot.slane %v5003_v5, 7 }
 0x274   :  { %4589 = vmatprep.subr.bf16.mxu0 %v5810_v61  ;;  %v1220_v37 = vcombine.high %v1204_v0, %v1204_v0  ;;  %v1221_v38 = vcombine.high %v1211_v1, %v1211_v1  ;;  %v539_v39 = vrot.slane %v531_v23, %v4952_v28  ;;  %v566_v40 = vcombine.low %v524_v11, %v526_v24 }
 0x275   :  { %v548_v35 = vcombine.low %v490_v21, %v492_v27  ;;  %v1230_v41 = vrot.slane %v1171_v6, %v4956_v30  ;;  %v1283_v44 = vcombine.low %v1211_v1, %v1219_v34  ;;  %v1239_v46 = vcombine.high %v1237_v25, %v1237_v25 }
 0x276   :  { %v1284_v45 = vcombine.low %v1221_v38, %v1204_v0  ;;  %v547_v47 = vcombine.low %v539_v39, %v546_v29  ;;  %v563_v48 = vrot.slane %v549_v31, %v4952_v28  ;;  %v573_v49 = vrot.slane %v4181_v33, %v4952_v28 }
 0x277   :  { %4591 = vmatpush3.bf16.msra.mxu0 %v4590_v26  ;;  %v556_v43 = vrot.slane %v548_v35, %v4952_v28  ;;  %v1238_v50 = vcombine.high %v1230_v41, %v1230_v41  ;;  %v1222_v53 = vcombine.high %v1218_v36, %v1218_v36  ;;  %v1246_v54 = vrot.slane %v1230_v41, %v4956_v30 }
 0x278   :  { %4592 = vmatprep.subr.bf16.mxu0 %v5810_v61  ;;  %v1285_v55 = vcombine.low %v1218_v36, %v1220_v37  ;;  %v1300_v56 = vrot.slane %v1284_v45, %v4956_v30  ;;  %v1253_v58 = vrot.slane %v1237_v25, %v4956_v30  ;;  %v1267_v59 = vrot.slane %v1239_v46, %v4956_v30 }
 0x279   :  { %v1260_v57 = vrot.slane %v1238_v50, %v4956_v30  ;;  %v5047_v62 = vsel %vm379_vm9, %v734_v42, %v4959_v32  ;;  %v564_v63 = vcombine.low %v556_v43, %v563_v48  ;;  %v580_v0 = vrot.slane %v566_v40, %v4952_v28 }
 0x27a   :  { %4398 = vmatmul.mubr.msk.f32.vlgmr.msra.gmra.mrb[6].mxu0 %vm93_vm0, %v547_v47  ;;  %5815 = vst [vmem:[#allocation8_spill] sm:$0xff] %v5047_v62  ;;  %v1293_v1 = vrot.slane %v1283_v44, %v4956_v30  ;;  %v736_v2 = vrot.slane %v4982_v51, 6  ;;  %v1333_v6 = vcombine.low %v1253_v58, %v1267_v59  ;;  %v4188_v7 = vcombine.high %v1253_v58, %v1267_v59 }
 0x27b   :  { %4400 = vmatprep.mubr.msk.f32.mxu0 %vm4726_vm6, %v5808_v8  ;;  %v1286_v3 = vcombine.low %v1222_v53, %v1260_v57  ;;  %v4187_v4 = vcombine.high %v1246_v54, %v1260_v57  ;;  %v1307_v9 = vrot.slane %v1285_v55, %v4956_v30  ;;  %v738_v12 = vrot.slane %v4993_v60, 5 }
 0x27c   :  { %v1315_v10 = vcombine.low %v1293_v1, %v1300_v56  ;;  %v737_v11 = vsel %vm382_vm10, %v736_v2, %v5047_v62  ;;  %v1348_v15 = vrot.slane %v1333_v6, %v4956_v30  ;;  %v1355_v16 = vrot.slane %v4188_v7, %v4956_v30 }
 0x27d   :  { %v1314_v13 = vrot.slane %v1286_v3, %v4956_v30  ;;  %v1341_v14 = vrot.slane %v4187_v4, %v4956_v30  ;;  %v5066_v17 = vsel %vm385_vm11, %v738_v12, %v737_v11  ;;  %v581_v19 = vcombine.low %v573_v49, %v580_v0 }
 0x27e   :  { %4401 = vmatmul.mubr.msk.f32.gmra.mrb[8].mxu0 %vm93_vm0, %v564_v63  ;;  %v1323_v23 = vrot.slane %v1315_v10, %v4956_v30  ;;  %v1370_v26 = vrot.slane %v1355_v16, %v4956_v30  ;;  %v5080_v31 = vsub.s32 0, %v4946_v22  ;;  %vm2725_vm8 = vcmask 56320  }
 0x27f   :  { %4403 = vmatprep.mubr.msk.f32.mxu0 %vm4726_vm6, %v5808_v8  ;;  %v1316_v20 = vcombine.low %v1307_v9, %v1314_v13  ;;  %v1356_v21 = vcombine.low %v1341_v14, %v1348_v15 }
 0x280   :  { %v749_v35 = vrot.slane %v4959_v32, %v5080_v31  ;;  %v753_v36 = vrot.slane %v5003_v5, %v5080_v31  ;;  %v757_v37 = vrot.slane %v4982_v51, %v5080_v31  ;;  %v761_v43 = vrot.slane %v4993_v60, %v5080_v31 }
 0x281   :  { %v1330_v24 = vrot.slane %v1316_v20, %v4956_v30  ;;  %v1363_v25 = vrot.slane %v1356_v21, %v4956_v30 }
 0x282   :  { %4404 = vmatmul.mubr.msk.f32.gmra.mrb[10].mxu0 %vm93_vm0, %v581_v19  ;;  %v773_v38 = vrot.slane %v749_v35, %v4952_v28  ;;  %v766_v40 = vcombine.high %v749_v35, %v749_v35  ;;  %v782_v41 = vcombine.high %v753_v36, %v753_v36  ;;  %v789_v42 = vrot.slane %v753_v36, %v4952_v28 }
 0x283   :  { %4422 = vmatprep.mubr.msk.f32.mxu0 %vm4726_vm6, %v5808_v8  ;;  %v1331_v27 = vcombine.low %v1323_v23, %v1330_v24  ;;  %v1371_v29 = vcombine.low %v1363_v25, %v1370_v26  ;;  %v805_v47 = vrot.slane %v757_v37, %v4952_v28  ;;  %v798_v53 = vcombine.high %v757_v37, %v757_v37 }
 0x284   :  { %v781_v50 = vcombine.high %v773_v38, %v773_v38  ;;  %v780_v54 = vrot.slane %v766_v40, %v4952_v28  ;;  %v796_v56 = vrot.slane %v782_v41, %v4952_v28  ;;  %v797_v57 = vcombine.high %v789_v42, %v789_v42 }
 0x285   :  { %4433 = vmatprep.mubr.msk.f32.mxu1 %vm93_vm0, %v1331_v27  ;;  %v821_v58 = vrot.slane %v761_v43, %v4952_v28  ;;  %v813_v6 = vcombine.high %v805_v47, %v805_v47  ;;  %v814_v7 = vcombine.high %v761_v43, %v761_v43  ;;  %v812_v12 = vrot.slane %v798_v53, %v4952_v28 }
 0x286   :  { %4434 = vmatmul.mubr.msk.f32.vlgmr.msra.gmra.mrb[4].mxu1 %vm93_vm0, %v1371_v29 }
 0x287   :  { %4438 = vmatprep.mubr.msk.f32.mxu1 %vm4726_vm6, %v5808_v8  ;;  %v829_v16 = vcombine.high %v821_v58, %v821_v58  ;;  %v828_v41 = vrot.slane %v814_v7, %v4952_v28 }
 0x345   :  { %v5082_v33 = vpop.f32.mrb[4].mxu0 }
 0x346   :  { %v4388_v34 = vpop.f32.mrb[5].mxu0 }
 0x34d   :  { %v654_v39 = vpop.f32.mrb[6].mxu0 }
 0x34e   :  { %v671_v44 = vcombine.high %v654_v39, %v654_v39  ;;  %v678_v45 = vrot.slane %v654_v39, %v4952_v28  ;;  %v4399_v46 = vpop.f32.mrb[7].mxu0 }
 0x350   :  { %v685_v48 = vrot.slane %v671_v44, %v4952_v28  ;;  %v686_v49 = vcombine.high %v678_v45, %v678_v45  ;;  %v842_v63 = vmul.f32 %v773_v38, %v678_v45 }
 0x351   :  { %v659_v55 = vpop.f32.mrb[8].mxu0 }
 0x352   :  { %v687_v59 = vcombine.high %v685_v48, %v685_v48  ;;  %v843_v0 = vmul.f32 %v781_v50, %v686_v49  ;;  %v688_v1 = vcombine.high %v659_v55, %v659_v55  ;;  %v4402_v2 = vpop.f32.mrb[9].mxu0  ;;  %v844_v3 = vmul.f32 %v780_v54, %v685_v48 }
 0x353   :  { %v695_v4 = vrot.slane %v659_v55, %v4952_v28 }
 0x354   :  { %v866_v9 = vcombine.low %v842_v63, %v843_v0  ;;  %v702_v10 = vrot.slane %v688_v1, %v4952_v28  ;;  %v845_v11 = vmul.f32 %v789_v42, %v687_v59  ;;  %v880_v29 = vrot.slane %v844_v3, %v4952_v28  ;;  %v4186_v3 = vld [vmem:[%s5803_s13] ss:$0 sm:$0xff]  ;;  %s4732_s13 = smov 112  }
 0x355   :  { %v703_v13 = vcombine.high %v695_v4, %v695_v4  ;;  %v846_v14 = vmul.f32 %v797_v57, %v695_v4  ;;  %v664_v15 = vpop.f32.mrb[10].mxu0 }
 0x356   :  { %v704_v19 = vcombine.high %v702_v10, %v702_v10  ;;  %v848_v20 = vmul.f32 %v805_v47, %v702_v10  ;;  %v705_v21 = vcombine.high %v664_v15, %v664_v15  ;;  %v712_v23 = vrot.slane %v664_v15, %v4952_v28  ;;  %v4405_v24 = vpop.f32.mrb[11].mxu0 }
 0x357   :  { %v847_v25 = vmul.f32 %v796_v56, %v703_v13  ;;  %v882_v26 = vcombine.low %v845_v11, %v846_v14  ;;  %v873_v27 = vrot.slane %v866_v9, %v4952_v28  ;;  %v741_v56 = vmul.f32 %v5066_v17, %v5082_v33 }
 0x358   :  { %v849_v34 = vmul.f32 %v813_v6, %v704_v19  ;;  %v719_v35 = vrot.slane %v705_v21, %v4952_v28  ;;  %v720_v36 = vcombine.high %v712_v23, %v712_v23  ;;  %v850_v37 = vmul.f32 %v812_v12, %v712_v23 }
 0x359   :  { %v881_v38 = vcombine.low %v873_v27, %v880_v29  ;;  %v889_v39 = vrot.slane %v882_v26, %v4952_v28  ;;  %v896_v40 = vrot.slane %v847_v25, %v4952_v28  ;;  %v4435_v45 = vpop.f32.mrb[4].mxu1  ;;  %v743_v1 = vsel %vm742_vm13, %v741_v56, 0.0 }
 0x35a   :  { %v721_v42 = vcombine.high %v719_v35, %v719_v35  ;;  %v851_v43 = vmul.f32 %v821_v58, %v720_v36  ;;  %v852_v44 = vmul.f32 %v829_v16, %v719_v35  ;;  %v898_v46 = vcombine.low %v848_v20, %v849_v34  ;;  %v1442_v47 = vpop.f32.mrb[5].mxu1 }
 0x35b   :  { %v935_v48 = vsel %vm934_vm12, %v881_v38, 0.0  ;;  %v897_v49 = vcombine.low %v889_v39, %v896_v40  ;;  %v912_v53 = vrot.slane %v850_v37, %v4952_v28  ;;  %v1443_v4 = vadd.f32 %v4186_v3, %v1442_v47 }
 0x35c   :  { %936 = vadd.xlane.f32.xlu0 %v935_v48  ;;  %v905_v50 = vrot.slane %v898_v46, %v4952_v28  ;;  %v853_v54 = vmul.f32 %v828_v41, %v721_v42  ;;  %v914_v55 = vcombine.low %v851_v43, %v852_v44  ;;  %v1448_v12 = vadd.f32 %v4435_v45, %v4186_v3 }
 0x35d   :  { %v938_v57 = vsel %vm934_vm12, %v897_v49, 0.0  ;;  %v1460_v6 = vrot.slane %v1443_v4, %v4956_v30  ;;  %v1453_v7 = vcombine.high %v1443_v4, %v1443_v4  ;;  %v5185_v26 = vand.u32 127, %v463_v18 }
 0x35e   :  { %939 = vadd.xlane.f32.xlu1 %v938_v57  ;;  %v913_v58 = vcombine.low %v905_v50, %v912_v53  ;;  %v921_v59 = vrot.slane %v914_v55, %v4952_v28  ;;  %v928_v63 = vrot.slane %v853_v54, %v4952_v28  ;;  %v1509_v15 = vrot.slane %v1448_v12, %v4956_v30 }
 0x35f   :  { %v1468_v9 = vcombine.high %v1460_v6, %v1460_v6  ;;  %v1467_v28 = vrot.slane %v1453_v7, %v4956_v30  ;;  %v5126_v10 = vrot.slane %v1460_v6, %v4956_v30  ;;  %v953_v27 = vadd.s32 4294967295, %v5185_v26 }
 0x360   :  { %v941_v0 = vsel %vm934_vm12, %v913_v58, 0.0  ;;  %v929_v2 = vcombine.low %v921_v59, %v928_v63  ;;  %v1517_v20 = vcombine.high %v1509_v15, %v1509_v15  ;;  %v1502_v50 = vcombine.high %v1448_v12, %v1448_v12 }
 0x361   :  { %942 = vadd.xlane.f32.xlu0 %v941_v0  ;;  %v5129_v11 = vrot.slane %v1468_v9, %v4956_v30  ;;  %v1469_v13 = vcombine.high %v1467_v28, %v1467_v28  ;;  %v1498_v14 = vcombine.high %v5126_v10, %v5126_v10  ;;  %v5138_v16 = vrot.slane %v1467_v28, %v4956_v30 }
 0x362   :  { %744 = vadd.xlane.f32.xlu1 %v743_v1  ;;  %v944_v33 = vsel %vm934_vm12, %v929_v2, 0.0  ;;  %v5152_v23 = vrot.slane %v1517_v20, %v4956_v30  ;;  %v956_v35 = vsub.s32 %v953_v27, %v4946_v22  ;;  %v5201_v53 = vrot.slane %v1509_v15, %v4956_v30 }
 0x363   :  { %v5141_v19 = vrot.slane %v1469_v13, %v4956_v30  ;;  %v5164_v25 = vcombine.high %v5138_v16, %v5138_v16  ;;  %v1500_v49 = vcombine.high %v5129_v11, %v5129_v11  ;;  %v1516_v54 = vrot.slane %v1502_v50, %v4956_v30 }
 0x364   :  { %v5158_v24 = vcombine.high %v5152_v23, %v5152_v23  ;;  %v5208_v55 = vcombine.high %v5201_v53, %v5201_v53 }
 0x365   :  { %945 = vadd.xlane.f32.xlu0 %v944_v33  ;;  %v5147_v21 = vcombine.high %v5141_v19, %v5141_v19  ;;  %v1518_v56 = vcombine.high %v1516_v54, %v1516_v54  ;;  %v5213_v57 = vrot.slane %v1516_v54, %v4956_v30  ;;  %v1633_v54 = vcombine.low %v5126_v10, %v5129_v11 }
 0x366   :  { %v1759_v8 = vcombine.low %v5152_v23, %v5208_v55 }
 0x367   :  { %v5218_v58 = vrot.slane %v1518_v56, %v4956_v30  ;;  %v4191_v56 = vcombine.high %v5126_v10, %v5129_v11  ;;  %v1642_v61 = vrot.slane %v1633_v54, %v4956_v30 }
 0x373   :  { %1551 = vrot.lane.b32.xlu1 %v5129_v11, %s4731_s29 }
 0x377   :  { %1553 = vrot.lane.b32.xlu1 %v1498_v14, %s4731_s29 }
 0x37b   :  { %1557 = vrot.lane.b32.xlu1 %v5138_v16, %s4731_s29 }
 0x37f   :  { %1563 = vrot.lane.b32.xlu1 %v5147_v21, %s4731_s29 }
 0x383   :  { %1567 = vrot.lane.b32.xlu1 %v5152_v23, %s4731_s29 }
 0x387   :  { %1571 = vrot.lane.b32.xlu1 %v5158_v24, %s4731_s29 }
 0x38b   :  { %1561 = vrot.lane.b32.xlu1 %v5164_v25, %s4731_s29 }
 0x38f   :  { %1577 = vrot.lane.b32.xlu1 %v5126_v10, %s4732_s13 }
 0x393   :  { %1581 = vrot.lane.b32.xlu1 %v1498_v14, %s4732_s13 }
 0x397   :  { %1585 = vrot.lane.b32.xlu1 %v5138_v16, %s4732_s13 }
 0x39b   :  { %1591 = vrot.lane.b32.xlu1 %v5147_v21, %s4732_s13 }
 0x39f   :  { %1595 = vrot.lane.b32.xlu1 %v5152_v23, %s4732_s13 }
 0x3a3   :  { %1599 = vrot.lane.b32.xlu1 %v5158_v24, %s4732_s13 }
 0x3a7   :  { %1589 = vrot.lane.b32.xlu1 %v5164_v25, %s4732_s13 }
 0x3ab   :  { %1605 = vrot.lane.b32.xlu1 %v5126_v10, %s4733_s4 }
 0x3af   :  { %1609 = vrot.lane.b32.xlu1 %v1498_v14, %s4733_s4 }
 0x3e9   :  { %v937_v29 = vpop.xlane.xlu0 %936 }
 0x3ea   :  { %v957_v39 = vrot.slane %v937_v29, %v956_v35 }
 0x3eb   :  { %v940_v34 = vpop.xlane.xlu1 %939 }
 0x3ec   :  { %v961_v37 = vrot.slane %v940_v34, %v956_v35 }
 0x3ee   :  { %v943_v36 = vpop.xlane.xlu0 %942  ;;  %v970_v41 = vsel %vm379_vm9, %v961_v37, %v957_v39 }
 0x3ef   :  { %v965_v38 = vrot.slane %v943_v36, %v956_v35  ;;  %v745_v44 = vpop.xlane.xlu1 %744 }
 0x3f1   :  { %v971_v43 = vsel %vm382_vm10, %v965_v38, %v970_v41 }
 0x3f2   :  { %v946_v40 = vpop.xlane.xlu0 %945 }
 0x3f3   :  { %v969_v42 = vrot.slane %v946_v40, %v956_v35  ;;  %v1552_v33 = vpop.permute.xlu1 %1551 }
 0x3f5   :  { %v972_v18 = vsel %vm385_vm11, %v969_v42, %v971_v43 }
 0x3f6   :  { %v975_v45 = vsel %vm974_vm14, %v745_v44, %v972_v18 }
 0x3f7   :  { %vm976_vm15 = vcmp.gt.f32.partialorder %v975_v45, 0.0  ;;  %v977_v46 = vmul.f32 0.01, %v975_v45  ;;  %v1554_v6 = vpop.permute.xlu1 %1553 }
 0x3f9   :  { %v978_v47 = vsel %vm976_vm15, %v975_v45, %v977_v46 }
 0x3fa   :  { %v980_v48 = vsel %vm979_vm1, %v978_v47, -inf }
 0x3fb   :  { %981 = vmax.xlane.f32.xlu0 %v980_v48  ;;  %v1558_v9 = vpop.permute.xlu1 %1557 }
 0x3ff   :  { %v5264_v12 = vpop.permute.xlu1 %1563 }
 0x403   :  { %v5268_v14 = vpop.permute.xlu1 %1567 }
 0x407   :  { %v5272_v20 = vpop.permute.xlu1 %1571 }
 0x40b   :  { %v1562_v29 = vpop.permute.xlu1 %1561 }
 0x40f   :  { %v5278_v35 = vpop.permute.xlu1 %1577 }
 0x411   :  { %1549 = vrot.lane.b32.xlu0 %v5126_v10, %s4731_s29  ;;  %v1649_v10 = vrot.slane %v4191_v56, %v4956_v30 }
 0x413   :  { %v5282_v37 = vpop.permute.xlu1 %1581  ;;  %v1664_v54 = vcombine.low %v1642_v61, %v1649_v10  ;;  %v1912_v61 = vrot.slane %v1562_v29, %v4956_v30 }
 0x415   :  { %1555 = vrot.lane.b32.xlu0 %v1500_v49, %s4731_s29 }
 0x417   :  { %v5286_v39 = vpop.permute.xlu1 %1585 }
 0x419   :  { %1559 = vrot.lane.b32.xlu0 %v5141_v19, %s4731_s29 }
 0x41b   :  { %v5290_v41 = vpop.permute.xlu1 %1591 }
 0x41d   :  { %1565 = vrot.lane.b32.xlu0 %v5201_v53, %s4731_s29 }
 0x41f   :  { %v5294_v43 = vpop.permute.xlu1 %1595 }
 0x421   :  { %1569 = vrot.lane.b32.xlu0 %v5208_v55, %s4731_s29 }
 0x423   :  { %v5298_v18 = vpop.permute.xlu1 %1599 }
 0x425   :  { %1573 = vrot.lane.b32.xlu0 %v5213_v57, %s4731_s29 }
 0x427   :  { %v5302_v46 = vpop.permute.xlu1 %1589 }
 0x429   :  { %1575 = vrot.lane.b32.xlu0 %v5218_v58, %s4731_s29 }
 0x42b   :  { %v5306_v48 = vpop.permute.xlu1 %1605 }
 0x42d   :  { %1579 = vrot.lane.b32.xlu0 %v5129_v11, %s4732_s13 }
 0x42f   :  { %v5310_v50 = vpop.permute.xlu1 %1609 }
 0x431   :  { %1583 = vrot.lane.b32.xlu0 %v1500_v49, %s4732_s13 }
 0x435   :  { %1587 = vrot.lane.b32.xlu0 %v5141_v19, %s4732_s13 }
 0x439   :  { %1593 = vrot.lane.b32.xlu0 %v5201_v53, %s4732_s13 }
 0x43d   :  { %1597 = vrot.lane.b32.xlu0 %v5208_v55, %s4732_s13 }
 0x441   :  { %1601 = vrot.lane.b32.xlu0 %v5213_v57, %s4732_s13 }
 0x445   :  { %1603 = vrot.lane.b32.xlu0 %v5218_v58, %s4732_s13 }
 0x449   :  { %1607 = vrot.lane.b32.xlu0 %v5129_v11, %s4733_s4 }
 0x44d   :  { %1611 = vrot.lane.b32.xlu0 %v1500_v49, %s4733_s4 }
 0x451   :  { %1615 = vrot.lane.b32.xlu0 %v5141_v19, %s4733_s4 }
 0x455   :  { %1621 = vrot.lane.b32.xlu0 %v5201_v53, %s4733_s4 }
 0x459   :  { %1625 = vrot.lane.b32.xlu0 %v5208_v55, %s4733_s4 }
 0x45d   :  { %1629 = vrot.lane.b32.xlu0 %v5213_v57, %s4733_s4 }
 0x461   :  { %1631 = vrot.lane.b32.xlu0 %v5218_v58, %s4733_s4 }
 0x488   :  { %v982_v59 = vpop.xlane.xlu0 %981 }
 0x489   :  { %v983_v63 = vsub.f32 %v978_v47, %v982_v59  ;;  %v1635_v59 = vcombine.low %v5138_v16, %v5141_v19 }
 0x48b   :  { %v984_v0 = vmul.f32 1.442695, %v983_v63  ;;  %v1758_v63 = vcombine.low %v5147_v21, %v5201_v53  ;;  %v1656_v11 = vrot.slane %v1635_v59, %v4956_v30 }
 0x48c   :  { %v1550_v3 = vpop.permute.xlu0 %1549 }
 0x48d   :  { %4654 = vpow2.f32 %v984_v0  ;;  %v1760_v0 = vcombine.low %v5158_v24, %v5213_v57  ;;  %v1663_v57 = vrot.slane %v5164_v25, %v4956_v30  ;;  %v1882_v55 = vcombine.low %v1550_v3, %v1552_v33 }
 0x48f   :  { %v1781_v19 = vrot.slane %v1760_v0, %v4956_v30  ;;  %v1665_v59 = vcombine.low %v1656_v11, %v1663_v57 }
 0x490   :  { %v1556_v4 = vpop.permute.xlu0 %1555 }
 0x491   :  { %v1679_v3 = vrot.slane %v1665_v59, %v4956_v30 }
 0x494   :  { %v1560_v7 = vpop.permute.xlu0 %1559 }
 0x497   :  { %v5248_v1 = vpop.eup %4654 }
 0x498   :  { %v986_v2 = vsel %vm979_vm1, %v5248_v1, 0.0  ;;  %v5262_v28 = vpop.permute.xlu0 %1565 }
 0x499   :  { %987 = vadd.xlane.f32.xlu1 %v986_v2  ;;  %v2006_v29 = vcombine.low %v5264_v12, %v5262_v28 }
 0x49c   :  { %v5266_v13 = vpop.permute.xlu0 %1569 }
 0x49d   :  { %v2007_v57 = vcombine.low %v5268_v14, %v5266_v13  ;;  %v2160_v14 = vrot.slane %v5302_v46, %v4956_v30 }
 0x4a0   :  { %v5270_v15 = vpop.permute.xlu0 %1573 }
 0x4a1   :  { %v2008_v11 = vcombine.low %v5272_v20, %v5270_v15 }
 0x4a4   :  { %v5274_v27 = vpop.permute.xlu0 %1575 }
 0x4a8   :  { %v5276_v34 = vpop.permute.xlu0 %1579 }
 0x4aa   :  { %1613 = vrot.lane.b32.xlu1 %v5138_v16, %s4733_s4  ;;  %v1767_v16 = vrot.slane %v1758_v63, %v4956_v30 }
 0x4ac   :  { %v5280_v36 = vpop.permute.xlu0 %1583 }
 0x4ad   :  { %v2131_v28 = vcombine.low %v5282_v37, %v5280_v36  ;;  %v2015_v36 = vrot.slane %v2006_v29, %v4956_v30 }
 0x4ae   :  { %1619 = vrot.lane.b32.xlu1 %v5147_v21, %s4733_s4  ;;  %v1883_v21 = vcombine.low %v1554_v6, %v1556_v4 }
 0x4b0   :  { %v5284_v38 = vpop.permute.xlu0 %1587  ;;  %v1898_v4 = vrot.slane %v1883_v21, %v4956_v30 }
 0x4b2   :  { %1623 = vrot.lane.b32.xlu1 %v5152_v23, %s4733_s4  ;;  %v1788_v23 = vrot.slane %v5218_v58, %v4956_v30 }
 0x4b4   :  { %v5288_v40 = vpop.permute.xlu0 %1593  ;;  %v1790_v62 = vcombine.low %v1781_v19, %v1788_v23 }
 0x4b6   :  { %1627 = vrot.lane.b32.xlu1 %v5158_v24, %s4733_s4  ;;  %v1884_v24 = vcombine.low %v1558_v9, %v1560_v7  ;;  %v1672_v9 = vrot.slane %v1664_v54, %v4956_v30  ;;  %v1804_v0 = vrot.slane %v1790_v62, %v4956_v30  ;;  %v2036_v62 = vrot.slane %v5274_v27, %v4956_v30 }
 0x4b7   :  { %v2029_v27 = vrot.slane %v2008_v11, %v4956_v30  ;;  %v2022_v54 = vrot.slane %v2007_v57, %v4956_v30 }
 0x4b8   :  { %v5292_v42 = vpop.permute.xlu0 %1597  ;;  %v1905_v7 = vrot.slane %v1884_v24, %v4956_v30  ;;  %v5373_v12 = vcombine.low %v1672_v9, %v1679_v3 }
 0x4b9   :  { %v2038_v59 = vcombine.low %v2029_v27, %v2036_v62 }
 0x4ba   :  { %1617 = vrot.lane.b32.xlu1 %v5164_v25, %s4733_s4  ;;  %v1891_v25 = vrot.slane %v1882_v55, %v4956_v30  ;;  %v1914_v24 = vcombine.low %v1905_v7, %v1912_v61 }
 0x4bc   :  { %v5296_v44 = vpop.permute.xlu0 %1601  ;;  %v1913_v10 = vcombine.low %v1891_v25, %v1898_v4  ;;  %v1928_v46 = vrot.slane %v1914_v24, %v4956_v30  ;;  %v2146_v25 = vrot.slane %v2131_v28, %v4956_v30  ;;  %v1077_v28 = vld [vmem:[%s5800_s10 + $0x30] sm:$0xff] }
 0x4bd   :  { %v2256_v9 = vcombine.low %v5298_v18, %v5296_v44  ;;  %v5816_v18 = vmov 0.0|0.0  }
 0x4be   :  { %v1921_v37 = vrot.slane %v1913_v10, %v4956_v30  ;;  %v1073_v10 = vld [vmem:[%s5800_s10 + $0x10] sm:$0xff] }
 0x4c0   :  { %v5300_v45 = vpop.permute.xlu0 %1603 }
 0x4c1   :  { %v2284_v44 = vrot.slane %v5300_v45, %v4956_v30 }
 0x4c4   :  { %v5304_v47 = vpop.permute.xlu0 %1607 }
 0x4c8   :  { %v5308_v49 = vpop.permute.xlu0 %1611 }
 0x4c9   :  { %v2379_v3 = vcombine.low %v5310_v50, %v5308_v49  ;;  %v2037_v50 = vcombine.low %v2015_v36, %v2022_v54 }
 0x4cb   :  { %v2394_v45 = vrot.slane %v2379_v3, %v4956_v30 }
 0x4cc   :  { %v5322_v52 = vpop.permute.xlu0 %1615 }
 0x4d0   :  { %v5338_v56 = vpop.permute.xlu0 %1621 }
 0x526   :  { %v988_v2 = vpop.xlane.xlu1 %987 }
 0x527   :  { %4656 = vrcp.f32 %v988_v2  ;;  %v1774_v2 = vrot.slane %v1759_v8, %v4956_v30  ;;  %v1000_v8 = vsub.s32 1, %v4946_v22 }
 0x529   :  { %v1789_v63 = vcombine.low %v1767_v16, %v1774_v2  ;;  %v2132_v16 = vcombine.low %v5286_v39, %v5284_v38  ;;  %v5364_v2 = vpop.permute.xlu0 %1625  ;;  %v1014_v38 = vsub.s32 3, %v4946_v22  ;;  %v1007_v39 = vsub.s32 2, %v4946_v22 }
 0x52a   :  { %v5331_v53 = vpop.permute.xlu1 %1613 }
 0x52b   :  { %v1797_v33 = vrot.slane %v1789_v63, %v4956_v30 }
 0x52d   :  { %v5375_v13 = vcombine.low %v1797_v33, %v1804_v0  ;;  %v2380_v33 = vcombine.low %v5331_v53, %v5322_v52  ;;  %v2378_v52 = vcombine.low %v5306_v48, %v5304_v47 }
 0x52e   :  { %v5341_v6 = vpop.permute.xlu1 %1619 }
 0x52f   :  { %v2401_v47 = vrot.slane %v2380_v33, %v4956_v30  ;;  %v2387_v62 = vrot.slane %v2378_v52, %v4956_v30  ;;  %v1019_v33 = vrot.slane %v5003_v5, 1 }
 0x531   :  { %v4657_v58 = vpop.eup %4656 }
 0x532   :  { %v5355_v19 = vpop.permute.xlu1 %1623  ;;  %v990_v21 = vmul.f32 %v4657_v58, %v5248_v1  ;;  %v2130_v1 = vcombine.low %v5278_v35, %v5276_v34  ;;  %v1071_v34 = vld [vmem:[%s5800_s10] sm:$0xff]  ;;  %v1072_v35 = vld [vmem:[%s5800_s10 + $0x8] sm:$0xff]  ;;  %v1630_v58 = vpop.permute.xlu0 %1629 }
 0x533   :  { %v4593_v55 = vpack.c.bf16 %v1072_v35, %v1071_v34  ;;  %v2503_v48 = vcombine.low %v5355_v19, %v5364_v2  ;;  %v1075_v19 = vld [vmem:[%s5800_s10 + $0x20] sm:$0xff]  ;;  %v2502_v2 = vcombine.low %v5341_v6, %v5338_v56  ;;  %v2409_v34 = vcombine.low %v2387_v62, %v2394_v45 }
 0x534   :  { %v1001_v15 = vrot.slane %v990_v21, %v1000_v8  ;;  %v994_v20 = vrot.slane %v990_v21, %v5080_v31  ;;  %v2153_v31 = vrot.slane %v2132_v16, %v4956_v30  ;;  %v1015_v63 = vrot.slane %v990_v21, %v1014_v38 }
 0x535   :  { %v1008_v4 = vrot.slane %v990_v21, %v1007_v39  ;;  %v2139_v7 = vrot.slane %v2130_v1, %v4956_v30  ;;  %v2255_v8 = vcombine.low %v5294_v43, %v5292_v42  ;;  %4594 = vmatpush3.bf16.msra.mxu0 %v4593_v55  ;;  %v1074_v42 = vld [vmem:[%s5800_s10 + $0x18] sm:$0xff]  ;;  %v2254_v43 = vcombine.low %v5290_v41, %v5288_v40 }
 0x536   :  { %1003 = vbcast.lane.b32.xlu0 %v1001_v15, 256  ;;  %996 = vbcast.lane.b32.xlu1 %v994_v20, 256  ;;  %v1628_v23 = vpop.permute.xlu1 %1627  ;;  %v2162_v61 = vcombine.low %v2153_v31, %v2160_v14  ;;  %v4596_v49 = vpack.c.bf16 %v1074_v42, %v1073_v10  ;;  %v5415_v16 = vcombine.low %v1921_v37, %v1928_v46  ;;  %v1632_v15 = vpop.permute.xlu0 %1631  ;;  %v1078_v14 = vld [vmem:[%s5800_s10 + $0x38] sm:$0xff]  ;;  %v5818_v42 = vrot.slane %v4959_v32, 1 }
 0x537   :  { %4595 = vmatprep.subr.bf16.mxu0 %v5816_v18  ;;  %v2504_v53 = vcombine.low %v1628_v23, %v1630_v58  ;;  %v2052_v21 = vrot.slane %v2038_v59, %v4956_v30  ;;  %v2161_v24 = vcombine.low %v2139_v7, %v2146_v25  ;;  %v2270_v40 = vrot.slane %v2255_v8, %v4956_v30 }
 0x538   :  { %v2277_v41 = vrot.slane %v2256_v9, %v4956_v30  ;;  %v2263_v29 = vrot.slane %v2254_v43, %v4956_v30  ;;  %v2176_v20 = vrot.slane %v2162_v61, %v4956_v30  ;;  %v2045_v31 = vrot.slane %v2037_v50, %v4956_v30 }
 0x539   :  { %4597 = vmatpush3.bf16.msra.mxu0 %v4596_v49  ;;  %v2525_v38 = vrot.slane %v2504_v53, %v4956_v30  ;;  %v2169_v23 = vrot.slane %v2161_v24, %v4956_v30  ;;  %v2532_v56 = vrot.slane %v1632_v15, %v4956_v30  ;;  %v2518_v6 = vrot.slane %v2503_v48, %v4956_v30 }
 0x53a   :  { %1017 = vbcast.lane.b32.xlu0 %v1015_v63, 256  ;;  %1010 = vbcast.lane.b32.xlu1 %v1008_v4, 256  ;;  %v1618_v0 = vpop.permute.xlu1 %1617  ;;  %v2286_v57 = vcombine.low %v2277_v41, %v2284_v44  ;;  %v2285_v27 = vcombine.low %v2263_v29, %v2270_v40  ;;  %v5454_v35 = vcombine.low %v2045_v31, %v2052_v21  ;;  %v5817_v58 = vmov 0.0  }
 0x53b   :  { %v2408_v11 = vrot.slane %v1618_v0, %v4956_v30  ;;  %4598 = vmatprep.subr.bf16.mxu0 %v5816_v18  ;;  %v5456_v36 = vcombine.low %v2169_v23, %v2176_v20  ;;  %v4602_v37 = vpack.c.bf16 %v1078_v14, %v1077_v28  ;;  %v2511_v55 = vrot.slane %v2502_v2, %v4956_v30 }
 0x53c   :  { %v2300_v46 = vrot.slane %v2286_v57, %v4956_v30  ;;  %v2534_v54 = vcombine.low %v2525_v38, %v2532_v56  ;;  %v2293_v4 = vrot.slane %v2285_v27, %v4956_v30  ;;  %v2417_v7 = vrot.slane %v2409_v34, %v4956_v30 }
 0x53d   :  { %v2410_v39 = vcombine.low %v2401_v47, %v2408_v11  ;;  %v2533_v63 = vcombine.low %v2511_v55, %v2518_v6  ;;  %v1020_v50 = vrot.slane %v4982_v51, 1  ;;  %v1021_v53 = vrot.slane %v4993_v60, 1 }
 0x53e   :  { %1067 = vrot.lane.b32.xlu0 %v5066_v17, %s4734_s22  ;;  %1681 = vrot.lane.b32.xlu1 %v5373_v12, %s4725_s7  ;;  %v1076_v17 = vld [vmem:[%s5800_s10 + $0x28] sm:$0xff]  ;;  %v5468_v25 = vcombine.low %v2293_v4, %v2300_v46  ;;  %v2548_v9 = vrot.slane %v2534_v54, %v4956_v30  ;;  %s4735_s10 = smov 8  }
 0x53f   :  { %v4599_v1 = vpack.c.bf16 %v1076_v17, %v1075_v19  ;;  %v2424_v59 = vrot.slane %v2410_v39, %v4956_v30  ;;  %v2541_v61 = vrot.slane %v2533_v63, %v4956_v30 }
 0x541   :  { %4600 = vmatpush3.bf16.msra.mxu0 %v4599_v1  ;;  %v5470_v8 = vcombine.low %v2417_v7, %v2424_v59  ;;  %v5479_v3 = vcombine.low %v2541_v61, %v2548_v9 }
 0x542   :  { %1806 = vrot.lane.b32.xlu1 %v5375_v13, %s4725_s7  ;;  %1930 = vrot.lane.b32.xlu0 %v5415_v16, %s4725_s7 }
 0x543   :  { %4601 = vmatprep.subr.bf16.mxu0 %v5816_v18 }
 0x545   :  { %4603 = vmatpush3.bf16.msra.mxu0 %v4602_v37 }
 0x546   :  { %2054 = vrot.lane.b32.xlu1 %v5454_v35, %s4725_s7  ;;  %2178 = vrot.lane.b32.xlu0 %v5456_v36, %s4725_s7 }
 0x547   :  { %4446 = vmatprep.subr.mxu0 %v5817_v58 }
 0x54a   :  { %2302 = vrot.lane.b32.xlu1 %v5468_v25, %s4725_s7  ;;  %2426 = vrot.lane.b32.xlu0 %v5470_v8, %s4725_s7 }
 0x54e   :  { %2550 = vrot.lane.b32.xlu1 %v5479_v3, %s4725_s7  ;;  %s4736_s7 = smov 16  }
 0x5a8   :  { %v997_v0 = vpop.permute.xlu1 %996  ;;  %v1004_v10 = vpop.permute.xlu0 %1003 }
 0x5a9   :  { %v1026_v43 = vmul.f32 %v997_v0, %v5818_v42  ;;  %v1027_v44 = vmul.f32 %v1019_v33, %v1004_v10 }
 0x5ab   :  { %v1031_v52 = vsel %vm1030_vm2, %v1026_v43, 0.0  ;;  %v1038_v49 = vsel %vm1030_vm2, %v1027_v44, 0.0 }
 0x5ac   :  { %v1032_v11 = vrot.slane %v1031_v52, 4  ;;  %v1039_v21 = vrot.slane %v1038_v49, 4  ;;  %v1011_v24 = vpop.permute.xlu1 %1010  ;;  %v1018_v40 = vpop.permute.xlu0 %1017 }
 0x5ad   :  { %v1028_v41 = vmul.f32 %v1020_v50, %v1011_v24  ;;  %v1029_v45 = vmul.f32 %v1021_v53, %v1018_v40 }
 0x5ae   :  { %v1033_v47 = vadd.f32 %v1032_v11, %v1031_v52  ;;  %v1040_v48 = vadd.f32 %v1039_v21, %v1038_v49 }
 0x5af   :  { %v1045_v29 = vsel %vm1030_vm2, %v1028_v41, 0.0  ;;  %v1052_v57 = vsel %vm1030_vm2, %v1029_v45, 0.0 }
 0x5b0   :  { %v1034_v62 = vrot.slane %v1033_v47, 2  ;;  %v1041_v15 = vrot.slane %v1040_v48, 2  ;;  %v1046_v20 = vrot.slane %v1045_v29, 4  ;;  %v1053_v19 = vrot.slane %v1052_v57, 4  ;;  %v1682_v51 = vpop.permute.xlu1 %1681  ;;  %v1068_v6 = vpop.permute.xlu0 %1067 }
 0x5b1   :  { %4437 = vmatpush3.xpose.msk.msra.mxu1 %vm1683_vm3, %v1682_v51 }
 0x5b2   :  { %v1035_v60 = vadd.f32 %v1034_v62, %v1033_v47  ;;  %v1042_v17 = vadd.f32 %v1041_v15, %v1040_v48  ;;  %v1047_v2 = vadd.f32 %v1046_v20, %v1045_v29  ;;  %v1054_v38 = vadd.f32 %v1053_v19, %v1052_v57  ;;  %4441 = vmatprep.subr.mxu1 %v5817_v58 }
 0x5b4   :  { %v1036_v39 = vrot.slane %v1035_v60, 1  ;;  %v1043_v1 = vrot.slane %v1042_v17, 1  ;;  %v1048_v28 = vrot.slane %v1047_v2, 2  ;;  %v1055_v14 = vrot.slane %v1054_v38, 2  ;;  %4439 = vmatmul.mubr.msk.f32.vlgmr.msra.gmra.mrb[6].mxu1 %vm1683_vm3, %v5373_v12  ;;  %v1807_v27 = vpop.permute.xlu1 %1806  ;;  %v1931_v61 = vpop.permute.xlu0 %1930 }
 0x5b5   :  { %4442 = vmatpush3.xpose.msk.msra.mxu1 %vm1683_vm3, %v1807_v27  ;;  %4443 = vmatprep.mubr.msk.f32.mxu1 %vm4726_vm6, %v5817_v58 }
 0x5b6   :  { %v1049_v31 = vadd.f32 %v1048_v28, %v1047_v2  ;;  %v1056_v23 = vadd.f32 %v1055_v14, %v1054_v38  ;;  %4451 = vmatprep.subr.mxu1 %v5817_v58  ;;  %v1037_v34 = vadd.f32 %v1036_v39, %v1035_v60  ;;  %v1044_v56 = vadd.f32 %v1043_v1, %v1042_v17 }
 0x5b8   :  { %v1050_v37 = vrot.slane %v1049_v31, 1  ;;  %v1057_v46 = vrot.slane %v1056_v23, 1  ;;  %4444 = vmatmul.mubr.msk.f32.vlgmr.msra.gmra.mrb[8].mxu1 %vm1683_vm3, %v5375_v13  ;;  %v2055_v55 = vpop.permute.xlu1 %2054  ;;  %v1063_v63 = vsel %vm379_vm9, %v1044_v56, %v1037_v34  ;;  %v2179_v42 = vpop.permute.xlu0 %2178 }
 0x5b9   :  { %4452 = vmatpush3.xpose.msk.msra.mxu1 %vm1683_vm3, %v2055_v55  ;;  %4453 = vmatprep.mubr.msk.f32.mxu1 %vm4726_vm6, %v5817_v58 }
 0x5ba   :  { %v1051_v54 = vadd.f32 %v1050_v37, %v1049_v31  ;;  %v1058_v59 = vadd.f32 %v1057_v46, %v1056_v23  ;;  %4461 = vmatprep.subr.mxu1 %v5817_v58 }
 0x5bc   :  { %v1064_v4 = vsel %vm382_vm10, %v1051_v54, %v1063_v63  ;;  %4454 = vmatmul.mubr.msk.f32.vlgmr.msra.gmra.mrb[10].mxu1 %vm1683_vm3, %v5454_v35  ;;  %v2303_v7 = vpop.permute.xlu1 %2302  ;;  %v2427_v43 = vpop.permute.xlu0 %2426  ;;  %vm3367_vm10 = vcmask 130048  }
 0x5bd   :  { %v1065_v9 = vsel %vm385_vm11, %v1058_v59, %v1064_v4  ;;  %4462 = vmatpush3.xpose.msk.msra.mxu1 %vm1683_vm3, %v2303_v7  ;;  %4463 = vmatprep.mubr.msk.f32.mxu1 %vm4726_vm6, %v5817_v58  ;;  %vm3370_vm11 = vcmask 195584  }
 0x5be   :  { %v5515_v33 = vsel %vm93_vm0, %v1065_v9, %v1068_v6  ;;  %4471 = vmatprep.subr.mxu1 %v5817_v58 }
 0x5bf   :  { %v1080_v0 = vrot.slane %v5515_v33, 2 }
 0x5c0   :  { %4464 = vmatmul.mubr.msk.f32.vlgmr.msra.gmra.mrb[12].mxu1 %vm1683_vm3, %v5468_v25  ;;  %v2551_v10 = vpop.permute.xlu1 %2550 }
 0x5c1   :  { %4423 = vmatmul.mubr.msk.f32.vlgmr.msra.gmra.mrb[12].mxu0 %vm1081_vm4, %v1080_v0  ;;  %4472 = vmatpush3.xpose.msk.msra.mxu1 %vm1683_vm3, %v2551_v10  ;;  %vm4113_vm4 = vcmp.eq.s32.totalorder %v5185_v26, 2 }
 0x5c2   :  { %4447 = vmatpush3.xpose.msk.msra.mxu0 %vm1683_vm3, %v1931_v61  ;;  %4473 = vmatprep.mubr.msk.f32.mxu1 %vm4726_vm6, %v5817_v58 }
 0x5c3   :  { %4448 = vmatprep.mubr.msk.f32.mxu0 %vm4726_vm6, %v5817_v58  ;;  %4456 = vmatprep.subr.mxu0 %v5817_v58 }
 0x5c4   :  { %4474 = vmatmul.mubr.msk.f32.vlgmr.msra.gmra.mrb[14].mxu1 %vm1683_vm3, %v5479_v3  ;;  %4481 = vmatprep.subr.mxu1 %v5817_v58 }
 0x5c5   :  { %4449 = vmatmul.mubr.msk.f32.vlgmr.msra.gmra.mrb[14].mxu0 %vm1683_vm3, %v5415_v16  ;;  %4483 = vmatprep.mubr.msk.f32.mxu1 %vm4726_vm6, %v5817_v58 }
 0x5c6   :  { %4457 = vmatpush3.xpose.msk.msra.mxu0 %vm1683_vm3, %v2179_v42  ;;  %4458 = vmatprep.mubr.msk.f32.mxu0 %vm4726_vm6, %v5817_v58 }
 0x5c7   :  { %4466 = vmatprep.subr.mxu0 %v5817_v58 }
 0x5c9   :  { %4459 = vmatmul.mubr.msk.f32.vlgmr.msra.gmra.mrb[16].mxu0 %vm1683_vm3, %v5456_v36 }
 0x5ca   :  { %4467 = vmatpush3.xpose.msk.msra.mxu0 %vm1683_vm3, %v2427_v43  ;;  %4468 = vmatprep.mubr.msk.f32.mxu0 %vm4726_vm6, %v5817_v58 }
 0x5cb   :  { %4476 = vmatprep.subr.mxu0 %v5817_v58 }
 0x5cd   :  { %4469 = vmatmul.mubr.msk.f32.vlgmr.msra.gmra.mrb[18].mxu0 %vm1683_vm3, %v5470_v8 }
 0x5ce   :  { %4478 = vmatprep.mubr.msk.f32.mxu0 %vm4726_vm6, %v5817_v58 }
 0x687   :  { %v1754_v44 = vpop.f32.mrb[6].mxu1 }
 0x688   :  { %v2626_v52 = vmul.f32 0.35355338, %v1754_v44  ;;  %v4440_v49 = vpop.f32.mrb[7].mxu1 }
 0x68a   :  { %v2635_v50 = vsel %vm2634_vm5, %v2626_v52, -inf }
 0x68b   :  { %v1878_v53 = vpop.f32.mrb[8].mxu1  ;;  %2636 = vmax.xlane.f32.xlu0 %v2635_v50 }
 0x68c   :  { %v2627_v11 = vmul.f32 0.35355338, %v1878_v53  ;;  %v4445_v21 = vpop.f32.mrb[9].mxu1 }
 0x68e   :  { %v2638_v24 = vsel %vm2634_vm5, %v2627_v11, -inf }
 0x68f   :  { %v2126_v40 = vpop.f32.mrb[10].mxu1  ;;  %2639 = vmax.xlane.f32.xlu1 %v2638_v24 }
 0x690   :  { %v4455_v41 = vpop.f32.mrb[11].mxu1  ;;  %v2629_v51 = vmul.f32 0.35355338, %v2126_v40 }
 0x692   :  { %v2644_v1 = vsel %vm2634_vm5, %v2629_v51, -inf }
 0x693   :  { %v2374_v45 = vpop.f32.mrb[12].mxu1 }
 0x694   :  { %v5551_v47 = vpop.f32.mrb[12].mxu0  ;;  %v4465_v48 = vpop.f32.mrb[13].mxu1  ;;  %v2631_v39 = vmul.f32 0.35355338, %v2374_v45 }
 0x695   :  { %v4424_v29 = vpop.f32.mrb[13].mxu0 }
 0x696   :  { %v2650_v34 = vsel %vm2634_vm5, %v2631_v39, -inf }
 0x697   :  { %v2622_v57 = vpop.f32.mrb[14].mxu1 }
 0x698   :  { %v2002_v62 = vpop.f32.mrb[14].mxu0  ;;  %v4475_v15 = vpop.f32.mrb[15].mxu1  ;;  %v2633_v23 = vmul.f32 0.35355338, %v2622_v57 }
 0x699   :  { %v5553_v20 = vmul.f32 0.35355338, %v2002_v62  ;;  %v4450_v19 = vpop.f32.mrb[15].mxu0 }
 0x69a   :  { %v2656_v6 = vsel %vm2634_vm5, %v2633_v23, -inf }
 0x69b   :  { %v2641_v60 = vsel %vm2634_vm5, %v5553_v20, -inf }
 0x69c   :  { %2642 = vmax.xlane.f32.xlu0 %v2641_v60  ;;  %v2250_v17 = vpop.f32.mrb[16].mxu0 }
 0x69d   :  { %v5557_v2 = vmul.f32 0.35355338, %v2250_v17  ;;  %v4460_v38 = vpop.f32.mrb[17].mxu0 }
 0x69f   :  { %v2647_v28 = vsel %vm2634_vm5, %v5557_v2, -inf }
 0x6a0   :  { %2645 = vmax.xlane.f32.xlu0 %v2644_v1  ;;  %2648 = vmax.xlane.f32.xlu1 %v2647_v28  ;;  %v2498_v14 = vpop.f32.mrb[18].mxu0 }
 0x6a1   :  { %v2632_v27 = vmul.f32 0.35355338, %v2498_v14  ;;  %v4470_v31 = vpop.f32.mrb[19].mxu0 }
 0x6a3   :  { %v2653_v56 = vsel %vm2634_vm5, %v2632_v27, -inf }
 0x6a4   :  { %2651 = vmax.xlane.f32.xlu0 %v2650_v34  ;;  %2654 = vmax.xlane.f32.xlu1 %v2653_v56 }
 0x6a8   :  { %2657 = vmax.xlane.f32.xlu0 %v2656_v6 }
 0x718   :  { %v2637_v37 = vpop.xlane.xlu0 %2636 }
 0x719   :  { %v2659_v46 = vsub.f32 %v2626_v52, %v2637_v37 }
 0x71b   :  { %v2667_v55 = vmul.f32 1.442695, %v2659_v46 }
 0x71c   :  { %v2640_v54 = vpop.xlane.xlu1 %2639 }
 0x71d   :  { %4658 = vpow2.f32 %v2667_v55  ;;  %v2660_v59 = vsub.f32 %v2627_v11, %v2640_v54 }
 0x71f   :  { %v2669_v63 = vmul.f32 1.442695, %v2660_v59 }
 0x721   :  { %4660 = vpow2.f32 %v2669_v63 }
 0x727   :  { %v5565_v4 = vpop.eup %4658 }
 0x728   :  { %v2683_v7 = vsel %vm2634_vm5, %v5565_v4, 0.0 }
 0x729   :  { %v2643_v9 = vpop.xlane.xlu0 %2642  ;;  %2684 = vadd.xlane.f32.xlu1 %v2683_v7 }
 0x72b   :  { %v5569_v61 = vpop.eup %4660 }
 0x72c   :  { %v2686_v0 = vsel %vm2634_vm5, %v5569_v61, 0.0 }
 0x72d   :  { %2687 = vadd.xlane.f32.xlu0 %v2686_v0  ;;  %v2646_v10 = vpop.xlane.xlu0 %2645  ;;  %v2649_v48 = vpop.xlane.xlu1 %2648 }
 0x72e   :  { %v2662_v42 = vsub.f32 %v2629_v51, %v2646_v10  ;;  %v2663_v57 = vsub.f32 %v5557_v2, %v2649_v48 }
 0x730   :  { %v2673_v43 = vmul.f32 1.442695, %v2662_v42  ;;  %v2675_v15 = vmul.f32 1.442695, %v2663_v57 }
 0x731   :  { %v2652_v44 = vpop.xlane.xlu0 %2651  ;;  %v2655_v62 = vpop.xlane.xlu1 %2654 }
 0x732   :  { %4662 = vpow2.f32 %v2673_v43  ;;  %v2664_v52 = vsub.f32 %v2631_v39, %v2652_v44  ;;  %v2665_v19 = vsub.f32 %v2632_v27, %v2655_v62 }
 0x734   :  { %v2677_v49 = vmul.f32 1.442695, %v2664_v52 }
 0x735   :  { %v2658_v50 = vpop.xlane.xlu0 %2657 }
 0x736   :  { %4664 = vpow2.f32 %v2677_v49  ;;  %v2666_v53 = vsub.f32 %v2633_v23, %v2658_v50 }
 0x738   :  { %v2681_v11 = vmul.f32 1.442695, %v2666_v53 }
 0x73a   :  { %4666 = vpow2.f32 %v2681_v11  ;;  %2723 = vrot.lane.b32.xlu1 %v5373_v12, %s4728_s8 }
 0x73c   :  { %v5575_v21 = vpop.eup %4662 }
 0x73d   :  { %v2692_v24 = vsel %vm2634_vm5, %v5575_v21, 0.0 }
 0x73e   :  { %2693 = vadd.xlane.f32.xlu0 %v2692_v24  ;;  %2879 = vrot.lane.b32.xlu1 %v5415_v16, %s4728_s8  ;;  %v2661_v16 = vsub.f32 %v5553_v20, %v2643_v9 }
 0x740   :  { %v5581_v40 = vpop.eup %4664  ;;  %v2671_v29 = vmul.f32 1.442695, %v2661_v16 }
 0x741   :  { %v2698_v41 = vsel %vm2634_vm5, %v5581_v40, 0.0 }
 0x742   :  { %2699 = vadd.xlane.f32.xlu0 %v2698_v41  ;;  %2956 = vrot.lane.b32.xlu1 %v5454_v35, %s4728_s8  ;;  %4668 = vpow2.f32 %v2671_v29  ;;  %v2679_v35 = vmul.f32 1.442695, %v2665_v19  ;;  %v3471_v19 = vld [vmem:[%s5804_s14] sm:$0xff] }
 0x743   :  { %4670 = vpow2.f32 %v2675_v15 }
 0x744   :  { %v5587_v45 = vpop.eup %4666  ;;  %4672 = vpow2.f32 %v2679_v35  ;;  %v3472_v35 = vld [vmem:[%s5804_s14 + $0x8] sm:$0xff] }
 0x745   :  { %v2704_v12 = vsel %vm2634_vm5, %v5587_v45, 0.0 }
 0x746   :  { %2705 = vadd.xlane.f32.xlu0 %v2704_v12  ;;  %3110 = vrot.lane.b32.xlu1 %v5468_v25, %s4728_s8 }
 0x74c   :  { %v5601_v25 = vpop.eup %4668 }
 0x74d   :  { %v2689_v20 = vsel %vm2634_vm5, %v5601_v25, 0.0  ;;  %v5605_v51 = vpop.eup %4670 }
 0x74e   :  { %v5609_v60 = vpop.eup %4672 }
 0x75c   :  { %2802 = vrot.lane.b32.xlu0 %v5375_v13, %s4728_s8  ;;  %v2695_v13 = vsel %vm2634_vm5, %v5605_v51, 0.0 }
 0x760   :  { %3033 = vrot.lane.b32.xlu0 %v5456_v36, %s4728_s8  ;;  %v2701_v36 = vsel %vm2634_vm5, %v5609_v60, 0.0  ;;  %vm4132_vm5 = vcmp.eq.s32.totalorder %v5185_v26, 1 }
 0x764   :  { %3187 = vrot.lane.b32.xlu0 %v5470_v8, %s4728_s8 }
 0x76a   :  { %2690 = vadd.xlane.f32.xlu1 %v2689_v20 }
 0x76e   :  { %2696 = vadd.xlane.f32.xlu1 %v2695_v13  ;;  %v3474_v13 = vld [vmem:[%s5804_s14 + $0x18] sm:$0xff] }
 0x772   :  { %2702 = vadd.xlane.f32.xlu1 %v2701_v36  ;;  %v3949_v36 = vmul.f32 %v5003_v5, %v5003_v5 }
 0x783   :  { %3264 = vrot.lane.b32.xlu1 %v5479_v3, %s4728_s8  ;;  %s4737_s8 = smov 24  }
 0x7b6   :  { %v2685_v8 = vpop.xlane.xlu1 %2684 }
 0x7b7   :  { %4674 = vrcp.f32 %v2685_v8  ;;  %v3948_v8 = vmul.f32 %v4959_v32, %v4959_v32 }
 0x7ba   :  { %v2724_v17 = vpop.permute.xlu1 %2723  ;;  %v2688_v3 = vpop.xlane.xlu0 %2687 }
 0x7bb   :  { %4477 = vmatpush3.msk.msra.mxu0 %vm2729_vm7, %v2724_v17  ;;  %4676 = vrcp.f32 %v2688_v3  ;;  %v3953_v17 = vsel %vm93_vm0, %v3949_v36, 0.0 }
 0x7bc   :  { %4486 = vmatprep.subr.mxu0 %v5817_v58 }
 0x7be   :  { %v2880_v39 = vpop.permute.xlu1 %2879 }
 0x7c1   :  { %v4675_v2 = vpop.eup %4674 }
 0x7c2   :  { %v2715_v38 = vmul.f32 %v4675_v2, %v5565_v4  ;;  %v2957_v23 = vpop.permute.xlu1 %2956  ;;  %v3950_v2 = vsel %vm93_vm0, %v3948_v8, 0.0 }
 0x7c4   :  { %4479 = vmatmul.mubr.msk.f32.vlgmr.msra.gmra.mrb[20].mxu0 %vm2725_vm8, %v2715_v38 }
 0x7c5   :  { %4487 = vmatpush3.msk.msra.mxu0 %vm2729_vm7, %v2880_v39  ;;  %4488 = vmatprep.mubr.msk.f32.mxu0 %vm4726_vm6, %v5817_v58  ;;  %v4677_v27 = vpop.eup %4676 }
 0x7c6   :  { %4496 = vmatprep.subr.mxu0 %v5817_v58  ;;  %v2716_v31 = vmul.f32 %v4677_v27, %v5569_v61  ;;  %v3111_v46 = vpop.permute.xlu1 %3110 }
 0x7cb   :  { %v2694_v1 = vpop.xlane.xlu0 %2693 }
 0x7cc   :  { %4678 = vrcp.f32 %v2694_v1 }
 0x7cf   :  { %v2700_v28 = vpop.xlane.xlu0 %2699 }
 0x7d0   :  { %4680 = vrcp.f32 %v2700_v28 }
 0x7d3   :  { %v2706_v14 = vpop.xlane.xlu0 %2705 }
 0x7d4   :  { %4682 = vrcp.f32 %v2706_v14 }
 0x7d6   :  { %v4679_v56 = vpop.eup %4678 }
 0x7d7   :  { %v2803_v34 = vpop.permute.xlu0 %2802  ;;  %v2718_v6 = vmul.f32 %v4679_v56, %v5575_v21 }
 0x7d8   :  { %4482 = vmatpush3.msk.msra.mxu1 %vm2729_vm7, %v2803_v34 }
 0x7d9   :  { %4484 = vmatmul.mubr.msk.f32.vlgmr.msra.gmra.mrb[16].mxu1 %vm2725_vm8, %v2716_v31  ;;  %4491 = vmatprep.subr.mxu1 %v5817_v58 }
 0x7da   :  { %4492 = vmatpush3.msk.msra.mxu1 %vm2729_vm7, %v2957_v23  ;;  %4493 = vmatprep.mubr.msk.f32.mxu1 %vm4726_vm6, %v5817_v58  ;;  %v4681_v37 = vpop.eup %4680 }
 0x7db   :  { %4501 = vmatprep.subr.mxu1 %v5817_v58  ;;  %v2720_v55 = vmul.f32 %v4681_v37, %v5581_v40  ;;  %v3034_v61 = vpop.permute.xlu0 %3033 }
 0x7dd   :  { %4494 = vmatmul.mubr.msk.f32.vlgmr.msra.gmra.mrb[18].mxu1 %vm2725_vm8, %v2718_v6 }
 0x7de   :  { %4502 = vmatpush3.msk.msra.mxu1 %vm2729_vm7, %v3111_v46  ;;  %4503 = vmatprep.mubr.msk.f32.mxu1 %vm4726_vm6, %v5817_v58  ;;  %v4683_v4 = vpop.eup %4682 }
 0x7df   :  { %4511 = vmatprep.subr.mxu1 %v5817_v58  ;;  %v2722_v9 = vmul.f32 %v4683_v4, %v5587_v45  ;;  %v3188_v44 = vpop.permute.xlu0 %3187 }
 0x7e1   :  { %4504 = vmatmul.mubr.msk.f32.vlgmr.msra.gmra.mrb[20].mxu1 %vm2725_vm8, %v2720_v55 }
 0x7e2   :  { %4513 = vmatprep.mubr.msk.f32.mxu1 %vm4726_vm6, %v5817_v58 }
 0x7f7   :  { %v2691_v54 = vpop.xlane.xlu1 %2690 }
 0x7f8   :  { %4684 = vrcp.f32 %v2691_v54 }
 0x7fb   :  { %v2697_v59 = vpop.xlane.xlu1 %2696 }
 0x7fc   :  { %4686 = vrcp.f32 %v2697_v59 }
 0x7ff   :  { %v2703_v63 = vpop.xlane.xlu1 %2702 }
 0x800   :  { %4688 = vrcp.f32 %v2703_v63 }
 0x802   :  { %v4685_v7 = vpop.eup %4684 }
 0x803   :  { %v2717_v0 = vmul.f32 %v4685_v7, %v5601_v25  ;;  %v3265_v10 = vpop.permute.xlu1 %3264  ;;  %v3473_v25 = vld [vmem:[%s5804_s14 + $0x10] sm:$0xff] }
 0x804   :  { %4512 = vmatpush3.msk.msra.mxu1 %vm2729_vm7, %v3265_v10 }
 0x805   :  { %4489 = vmatmul.mubr.msk.f32.vlgmr.msra.gmra.mrb[22].mxu0 %vm2725_vm8, %v2717_v0  ;;  %4514 = vmatmul.mubr.msk.f32.vlgmr.msra.gmra.mrb[22].mxu1 %vm2725_vm8, %v2722_v9 }
 0x806   :  { %v4687_v42 = vpop.eup %4686  ;;  %4497 = vmatpush3.msk.msra.mxu0 %vm2729_vm7, %v3034_v61  ;;  %4498 = vmatprep.mubr.msk.f32.mxu0 %vm4726_vm6, %v5817_v58 }
 0x807   :  { %v2719_v43 = vmul.f32 %v4687_v42, %v5605_v51  ;;  %4506 = vmatprep.subr.mxu0 %v5817_v58  ;;  %4620 = vmatprep.subr.bf16.mxu1 %v5816_v18  ;;  %v4612_v51 = vpack.c.bf16 %v3472_v35, %v3471_v19 }
 0x808   :  { %4535 = vmatprep.mubr.msk.f32.mxu1 %vm4726_vm6, %v5817_v58 }
 0x809   :  { %4499 = vmatmul.mubr.msk.f32.vlgmr.msra.gmra.mrb[24].mxu0 %vm2725_vm8, %v2719_v43 }
 0x80a   :  { %v4689_v52 = vpop.eup %4688  ;;  %4507 = vmatpush3.msk.msra.mxu0 %vm2729_vm7, %v3188_v44  ;;  %4508 = vmatprep.mubr.msk.f32.mxu0 %vm4726_vm6, %v5817_v58  ;;  %vm4133_vm7 = vcmp.eq.s32.totalorder %v4946_v22, 0 }
 0x80b   :  { %v2721_v49 = vmul.f32 %v4689_v52, %v5609_v60  ;;  %v4616_v60 = vpack.c.bf16 %v3474_v13, %v3473_v25  ;;  %4613 = vmatprep.subr.bf16.mxu0 %v4612_v51 }
 0x80d   :  { %4509 = vmatmul.mubr.msk.f32.vlgmr.msra.gmra.mrb[26].mxu0 %vm2725_vm8, %v2721_v49  ;;  %vm4154_vm8 = vcmp.eq.s32.totalorder %v4946_v22, 1 }
 0x80e   :  { %4615 = vmatpush3.bf16.msra.mxu0 %v4612_v51 }
 0x80f   :  { %4617 = vmatprep.subr.bf16.mxu0 %v4616_v60 }
 0x812   :  { %4619 = vmatpush3.bf16.msra.mxu0 %v4616_v60 }
 0x813   :  { %4538 = vmatprep.subr.mxu0 %v5817_v58 }
 0x897   :  { %v2798_v50 = vpop.f32.mrb[20].mxu0 }
 0x898   :  { %v4480_v53 = vpop.f32.mrb[21].mxu0 }
 0x8ac   :  { %v2875_v11 = vpop.f32.mrb[16].mxu1 }
 0x8ad   :  { %v4485_v21 = vpop.f32.mrb[17].mxu1 }
 0x8b0   :  { %v3029_v24 = vpop.f32.mrb[18].mxu1 }
 0x8b1   :  { %3345 = vrot.lane.b32.xlu1 %v3029_v24, %s4735_s10  ;;  %v4495_v40 = vpop.f32.mrb[19].mxu1 }
 0x8b4   :  { %v3183_v41 = vpop.f32.mrb[20].mxu1 }
 0x8b5   :  { %3353 = vrot.lane.b32.xlu1 %v3183_v41, %s4736_s7  ;;  %v4505_v45 = vpop.f32.mrb[21].mxu1 }
 0x8d8   :  { %v2952_v12 = vpop.f32.mrb[22].mxu0  ;;  %v3337_v48 = vpop.f32.mrb[22].mxu1 }
 0x8d9   :  { %3361 = vrot.lane.b32.xlu1 %v3337_v48, %s4737_s8  ;;  %v4515_v16 = vpop.f32.mrb[23].mxu1  ;;  %3343 = vrot.lane.b32.xlu0 %v2952_v12, %s4735_s10  ;;  %v4490_v29 = vpop.f32.mrb[23].mxu0 }
 0x8dc   :  { %v3106_v57 = vpop.f32.mrb[24].mxu0 }
 0x8dd   :  { %3351 = vrot.lane.b32.xlu0 %v3106_v57, %s4736_s7  ;;  %v4500_v62 = vpop.f32.mrb[25].mxu0 }
 0x8e0   :  { %v3260_v15 = vpop.f32.mrb[26].mxu0 }
 0x8e1   :  { %3359 = vrot.lane.b32.xlu0 %v3260_v15, %s4737_s8  ;;  %v4510_v20 = vpop.f32.mrb[27].mxu0 }
 0x8fd   :  { %3954 = vadd.xlane.f32.xlu1 %v3953_v17 }
 0x900   :  { %3951 = vadd.xlane.f32.xlu0 %v3950_v2 }
 0x923   :  { %v3346_v38 = vpop.permute.xlu1 %3345 }
 0x924   :  { %v3366_v3 = vsel %vm1683_vm3, %v2875_v11, %v3346_v38 }
 0x927   :  { %v3354_v39 = vpop.permute.xlu1 %3353 }
 0x928   :  { %v3369_v1 = vsel %vm3367_vm10, %v3366_v3, %v3354_v39 }
 0x94b   :  { %v3362_v28 = vpop.permute.xlu1 %3361  ;;  %v3344_v14 = vpop.permute.xlu0 %3343 }
 0x94c   :  { %v3372_v27 = vsel %vm3370_vm11, %v3369_v1, %v3362_v28  ;;  %v3365_v55 = vsel %vm1683_vm3, %v2798_v50, %v3344_v14 }
 0x94d   :  { %v3423_v31 = vcombine.high %v3372_v27, %v3372_v27  ;;  %v3430_v23 = vrot.slane %v3372_v27, %v4956_v30  ;;  %v3860_v27 = vld [vmem:[%s5801_s11] sm:$0xff] }
 0x94f   :  { %v3438_v34 = vcombine.high %v3430_v23, %v3430_v23  ;;  %v3352_v56 = vpop.permute.xlu0 %3351  ;;  %v3437_v6 = vrot.slane %v3423_v31, %v4956_v30  ;;  %v3446_v37 = vrot.slane %v3430_v23, %v4956_v30  ;;  %v3861_v31 = vld [vmem:[%s5801_s11 + $0x8] sm:$0xff]  ;;  %v3862_v23 = vld [vmem:[%s5801_s11 + $0x10] sm:$0xff] }
 0x950   :  { %v3368_v59 = vsel %vm3367_vm10, %v3365_v55, %v3352_v56  ;;  %vm4134_vm10 = vmand %vm4132_vm5, %vm4133_vm7 }
 0x951   :  { %v3460_v46 = vrot.slane %v3438_v34, %v4956_v30  ;;  %v3439_v4 = vcombine.high %v3437_v6, %v3437_v6  ;;  %v3453_v7 = vrot.slane %v3437_v6, %v4956_v30  ;;  %v3468_v9 = vcombine.high %v3446_v37, %v3446_v37  ;;  %v4224_v6 = vld [vmem:[%s5805_s15] ss:$0 sm:$0xff]  ;;  %s4235_s15 = sld [smem:[#allocation2 + $0x1]] }
 0x952   :  { %v4621_v34 = vpack.c.bf16 %v3861_v31, %v3860_v27 }
 0x953   :  { %v3470_v54 = vcombine.high %v3460_v46, %v3460_v46  ;;  %v3360_v63 = vpop.permute.xlu0 %3359  ;;  %v3467_v44 = vrot.slane %v3439_v4, %v4956_v30  ;;  %v3469_v52 = vcombine.high %v3453_v7, %v3453_v7  ;;  %v3531_v49 = vcombine.low %v3460_v46, %v3468_v9 }
 0x954   :  { %v3371_v61 = vsel %vm3370_vm11, %v3368_v59, %v3360_v63  ;;  %4622 = vmatpush3.bf16.msra.mxu1 %v4621_v34  ;;  %vm4155_vm11 = vmand %vm4132_vm5, %vm4154_vm8 }
 0x955   :  { %v3375_v0 = vcombine.high %v3371_v61, %v3371_v61  ;;  %v3532_v10 = vcombine.low %v3470_v54, %v3453_v7  ;;  %v3382_v42 = vrot.slane %v3371_v61, %v4956_v30  ;;  %v3533_v12 = vcombine.low %v3467_v44, %v3469_v52  ;;  %4623 = vmatprep.subr.bf16.mxu1 %v5816_v18 }
 0x956   :  { %v3540_v48 = vrot.slane %v3531_v49, %v4956_v30 }
 0x957   :  { %v3389_v43 = vrot.slane %v3375_v0, %v4956_v30  ;;  %v3390_v50 = vcombine.high %v3382_v42, %v3382_v42  ;;  %v3547_v21 = vrot.slane %v3532_v10, %v4956_v30  ;;  %v3398_v24 = vrot.slane %v3382_v42, %v4956_v30 }
 0x958   :  { %v3554_v51 = vrot.slane %v3533_v12, %v4956_v30 }
 0x959   :  { %v3391_v53 = vcombine.high %v3389_v43, %v3389_v43  ;;  %v3405_v11 = vrot.slane %v3389_v43, %v4956_v30  ;;  %v3412_v40 = vrot.slane %v3390_v50, %v4956_v30  ;;  %v3555_v15 = vcombine.low %v3540_v48, %v3547_v21 }
 0x95a   :  { %v3569_v2 = vrot.slane %v3554_v51, %v4956_v30 }
 0x95b   :  { %v3419_v41 = vrot.slane %v3391_v53, %v4956_v30  ;;  %v3421_v45 = vcombine.high %v3405_v11, %v3405_v11  ;;  %v3482_v16 = vcombine.low %v3398_v24, %v3412_v40  ;;  %v4225_v29 = vcombine.high %v3398_v24, %v3412_v40 }
 0x95c   :  { %v3562_v36 = vrot.slane %v3555_v15, %v4956_v30 }
 0x95d   :  { %v3484_v57 = vcombine.low %v3405_v11, %v3419_v41  ;;  %v3485_v62 = vcombine.low %v3421_v45, %v3446_v37  ;;  %v3492_v19 = vrot.slane %v3482_v16, %v4956_v30  ;;  %v3499_v35 = vrot.slane %v4225_v29, %v4956_v30 }
 0x95e   :  { %v3570_v39 = vcombine.low %v3562_v36, %v3569_v2 }
 0x95f   :  { %v3506_v25 = vrot.slane %v3484_v57, %v4956_v30  ;;  %v3513_v20 = vrot.slane %v3485_v62, %v4956_v30  ;;  %v3514_v13 = vcombine.low %v3492_v19, %v3499_v35 }
 0x961   :  { %v3515_v60 = vcombine.low %v3506_v25, %v3513_v20  ;;  %v3522_v8 = vrot.slane %v3514_v13, %v4956_v30 }
 0x963   :  { %v3529_v17 = vrot.slane %v3515_v60, %v4956_v30 }
 0x965   :  { %v3530_v38 = vcombine.low %v3522_v8, %v3529_v17 }
 0x967   :  { %4524 = vmatprep.mubr.msk.f32.mxu0 %vm93_vm0, %v3530_v38 }
 0x968   :  { %4525 = vmatmul.mubr.msk.f32.vlgmr.msra.gmra.mrb[28].mxu0 %vm93_vm0, %v3570_v39 }
 0x969   :  { %4540 = vmatprep.mubr.msk.f32.mxu0 %vm4726_vm6, %v5817_v58 }
 0x98a   :  { %v3955_v2 = vpop.xlane.xlu1 %3954 }
 0x98d   :  { %v3952_v3 = vpop.xlane.xlu0 %3951 }
 0x98e   :  { %v3956_v1 = vadd.f32 1e-12, %v3952_v3 }
 0x990   :  { %4690 = vrsqrt.f32 %v3956_v1  ;;  %v3957_v1 = vadd.f32 1e-12, %v3955_v2 }
 0x992   :  { %4692 = vrsqrt.f32 %v3957_v1 }
 0x99a   :  { %v4691_v28 = vpop.eup %4690 }
 0x99b   :  { %v3960_v14 = vmul.f32 %v4691_v28, %v4959_v32  ;;  %v3863_v32 = vld [vmem:[%s5801_s11 + $0x18] sm:$0xff]  ;;  %s4115_s11 = sld [smem:[#allocation2]] }
 0x99c   :  { %v4624_v56 = vpack.c.bf16 %v3863_v32, %v3862_v23 }
 0x99d   :  { %4539 = vmatpush3.xpose.msk.msra.mxu0 %vm93_vm0, %v3960_v14 }
 0x99e   :  { %4625 = vmatpush3.bf16.msra.mxu1 %v4624_v56 }
 0x99f   :  { %4543 = vmatprep.subr.mxu1 %v5817_v58 }
 0x9a0   :  { %4541 = vmatmul.mubr.msk.f32.vlgmr.msra.gmra.mrb[30].mxu0 %vm93_vm0, %v3960_v14 }
 0xa3b   :  { %v4526_v37 = vpop.f32.mrb[28].mxu0 }
 0xa3c   :  { %v3647_v46 = vadd.f32 %v4526_v37, %v4224_v6  ;;  %v3641_v55 = vpop.f32.mrb[29].mxu0 }
 0xa3d   :  { %v3642_v54 = vadd.f32 %v4224_v6, %v3641_v55 }
 0xa3e   :  { %v3701_v59 = vcombine.high %v3647_v46, %v3647_v46  ;;  %v3708_v63 = vrot.slane %v3647_v46, %v4956_v30 }
 0xa3f   :  { %v3652_v4 = vcombine.high %v3642_v54, %v3642_v54  ;;  %v3659_v7 = vrot.slane %v3642_v54, %v4956_v30 }
 0xa40   :  { %v3715_v9 = vrot.slane %v3701_v59, %v4956_v30  ;;  %v3716_v18 = vcombine.high %v3708_v63, %v3708_v63  ;;  %v3724_v61 = vrot.slane %v3708_v63, %v4956_v30 }
 0xa41   :  { %v3666_v0 = vrot.slane %v3652_v4, %v4956_v30  ;;  %v3667_v10 = vcombine.high %v3659_v7, %v3659_v7  ;;  %v3675_v49 = vrot.slane %v3659_v7, %v4956_v30  ;;  %v4693_v7 = vpop.eup %4692 }
 0xa42   :  { %v3717_v42 = vcombine.high %v3715_v9, %v3715_v9  ;;  %v3738_v43 = vrot.slane %v3716_v18, %v4956_v30  ;;  %v3746_v44 = vcombine.high %v3724_v61, %v3724_v61  ;;  %v3731_v11 = vrot.slane %v3715_v9, %v4956_v30 }
 0xa43   :  { %v3668_v52 = vcombine.high %v3666_v0, %v3666_v0  ;;  %v3682_v50 = vrot.slane %v3666_v0, %v4956_v30  ;;  %v3689_v53 = vrot.slane %v3667_v10, %v4956_v30  ;;  %v4117_v0 = vstv %s4115_s11 }
 0xa44   :  { %v3745_v21 = vrot.slane %v3717_v42, %v4956_v30  ;;  %v3747_v24 = vcombine.high %v3738_v43, %v3738_v43  ;;  %v3797_v48 = vcombine.low %v3738_v43, %v3746_v44  ;;  %vm4118_vm12 = vcmp.lt.s32.totalorder %v4946_v22, %v4117_v0 }
 0xa45   :  { %v3696_v40 = vrot.slane %v3668_v52, %v4956_v30  ;;  %v3698_v41 = vcombine.high %v3682_v50, %v3682_v50  ;;  %v3748_v45 = vcombine.low %v3675_v49, %v3689_v53  ;;  %v4228_v12 = vcombine.high %v3675_v49, %v3689_v53 }
 0xa46   :  { %v3798_v16 = vcombine.low %v3747_v24, %v3731_v11  ;;  %v3826_v35 = vrot.slane %v3745_v21, %v4956_v30  ;;  %v3812_v60 = vrot.slane %v3797_v48, %v4956_v30  ;;  %vm4119_vm13 = vcmp.lt.s32.totalorder %v5185_v26, %v4117_v0 }
 0xa47   :  { %v3700_v29 = vcombine.high %v3696_v40, %v3696_v40  ;;  %v3750_v57 = vcombine.low %v3682_v50, %v3696_v40  ;;  %v3757_v62 = vrot.slane %v3748_v45, %v4956_v30  ;;  %v3764_v15 = vrot.slane %v4228_v12, %v4956_v30  ;;  %vm4120_vm14 = vmand %vm4118_vm12, %vm4119_vm13 }
 0xa48   :  { %v3819_v19 = vrot.slane %v3798_v16, %v4956_v30  ;;  %v3778_v20 = vrot.slane %v3698_v41, %v4956_v30  ;;  %v4139_v24 = vstv %s4235_s15  ;;  %v5819_v41 = vld [vmem:[#allocation8_spill] sm:$0xff] }
 0xa49   :  { %v3771_v25 = vrot.slane %v3750_v57, %v4956_v30  ;;  %v3779_v51 = vcombine.low %v3757_v62, %v3764_v15  ;;  %v3796_v13 = vcombine.low %v3700_v29, %v3724_v61  ;;  %v3961_v61 = vmul.f32 %v4693_v7, %v5003_v5 }
 0xa4a   :  { %v3828_v36 = vcombine.low %v3819_v19, %v3826_v35  ;;  %vm4141_vm15 = vcmp.lt.s32.totalorder %v5185_v26, %v4139_v24  ;;  %v1154_v15 = vmul.f32 %v5551_v47, %v5515_v33 }
 0xa4b   :  { %v3780_v8 = vcombine.low %v3771_v25, %v3778_v20  ;;  %v3805_v17 = vrot.slane %v3796_v13, %v4956_v30  ;;  %v3787_v38 = vrot.slane %v3779_v51, %v4956_v30 }
 0xa4c   :  { %v3842_v28 = vrot.slane %v3828_v36, %v4956_v30 }
 0xa4d   :  { %v3794_v39 = vrot.slane %v3780_v8, %v4956_v30  ;;  %v3827_v3 = vcombine.low %v3805_v17, %v3812_v60  ;;  %v3946_v17 = vstv %s4230_s5 }
 0xa4f   :  { %v3795_v14 = vcombine.low %v3787_v38, %v3794_v39  ;;  %v3835_v27 = vrot.slane %v3827_v3, %v4956_v30  ;;  %v1160_v38 = vstv %s1159_s6 }
 0xa51   :  { %v3843_v31 = vcombine.low %v3835_v27, %v3842_v28  ;;  %v3846_v23 = vsel %vm1030_vm2, %v3795_v14, -inf }
 0xa52   :  { %v3847_v34 = vrot.slane %v3846_v23, 4 }
 0xa53   :  { %v3853_v32 = vsel %vm1030_vm2, %v3843_v31, -inf  ;;  %vm1155_vm2 = vcmask 517120  }
 0xa54   :  { %v3848_v56 = vmax.f32 %v3846_v23, %v3847_v34  ;;  %v3854_v6 = vrot.slane %v3853_v32, 4  ;;  %v1156_v35 = vsel %vm1155_vm2, %v1154_v15, 0.0 }
 0xa56   :  { %v3849_v37 = vrot.slane %v3848_v56, 2  ;;  %v3855_v46 = vmax.f32 %v3853_v32, %v3854_v6 }
 0xa58   :  { %v3850_v55 = vmax.f32 %v3848_v56, %v3849_v37  ;;  %v3856_v54 = vrot.slane %v3855_v46, 2 }
 0xa5a   :  { %v3851_v59 = vrot.slane %v3850_v55, 1  ;;  %v3857_v63 = vmax.f32 %v3855_v46, %v3856_v54 }
 0xa5c   :  { %v3858_v4 = vrot.slane %v3857_v63, 1  ;;  %v3852_v9 = vmax.f32 %v3850_v55, %v3851_v59 }
 0xa5e   :  { %v3859_v18 = vmax.f32 %v3857_v63, %v3858_v4 }
 0xa60   :  { %v3866_v30 = vsel %vm379_vm9, %v3859_v18, %v3852_v9  ;;  %vm4110_vm9 = vcmp.eq.s32.totalorder %v4946_v22, %v5185_v26 }
 0xa61   :  { %4536 = vmatmul.mubr.msk.f32.vlgmr.msra.gmra.mrb[24].mxu1 %vm93_vm0, %v3866_v30 }
 0xa62   :  { %4544 = vmatpush3.xpose.msk.msra.mxu1 %vm93_vm0, %v3961_v61  ;;  %4545 = vmatprep.mubr.msk.f32.mxu1 %vm4726_vm6, %v5817_v58  ;;  %vm4140_vm6 = vcmp.lt.s32.totalorder %v4946_v22, %v4139_v24 }
 0xa63   :  { %vm4142_vm1 = vmand %vm4140_vm6, %vm4141_vm15 }
 0xa65   :  { %4546 = vmatmul.mubr.msk.f32.vlgmr.msra.gmra.mrb[26].mxu1 %vm93_vm0, %v3961_v61  ;;  %vm3941_vm0 = vcmask 254976  }
 0xa73   :  { %v4031_v5 = vpop.f32.mrb[30].mxu0 }
 0xa74   :  { %v4116_v10 = vsel %vm4110_vm9, 1000000.0, %v4031_v5  ;;  %v4542_v42 = vpop.f32.mrb[31].mxu0 }
 0xa75   :  { %v4121_v43 = vsel %vm4120_vm14, %v4116_v10, inf }
 0xa76   :  { %v4122_v58 = vsel %vm1683_vm3, %v4121_v43, inf }
 0xa77   :  { %4123 = vmin.xlane.f32.xlu0 %v4122_v58 }
 0xb04   :  { %v4124_v44 = vpop.xlane.xlu0 %4123 }
 0xb05   :  { %v4125_v52 = vrot.slane %v4124_v44, 4 }
 0xb07   :  { %v4126_v49 = vmin.f32 %v4124_v44, %v4125_v52 }
 0xb09   :  { %v4127_v50 = vrot.slane %v4126_v49, 2 }
 0xb0b   :  { %v4128_v53 = vmin.f32 %v4126_v49, %v4127_v50 }
 0xb0d   :  { %v4129_v11 = vrot.slane %v4128_v53, 1 }
 0xb0f   :  { %v4130_v21 = vmin.f32 %v4128_v53, %v4129_v11 }
 0xb11   :  { %4626 = vpush %v4130_v21 }
 0xb34   :  { %v3935_v40 = vpop.f32.mrb[24].mxu1 }
 0xb35   :  { %v3940_v45 = vmul.f32 %v3935_v40, %v5819_v41  ;;  %v4537_v12 = vpop.f32.mrb[25].mxu1 }
 0xb37   :  { %v3942_v48 = vsel %vm3941_vm0, %v3940_v45, 0.0 }
 0xb38   :  { %3943 = vadd.xlane.f32.xlu1 %v3942_v48  ;;  %v4104_v16 = vpop.f32.mrb[26].mxu1 }
 0xb39   :  { %v4138_v29 = vsel %vm4110_vm9, 1000000.0, %v4104_v16  ;;  %v4547_v57 = vpop.f32.mrb[27].mxu1 }
 0xb3a   :  { %v4143_v62 = vsel %vm4142_vm1, %v4138_v29, inf }
 0xb3b   :  { %v4144_v19 = vsel %vm1683_vm3, %v4143_v62, inf  ;;  %vm4111_vm3 = vcmp.eq.s32.totalorder %v5185_v26, 0 }
 0xb3c   :  { %4145 = vmin.xlane.f32.xlu0 %v4144_v19 }
 0xb40   :  { %1157 = vadd.xlane.f32.xlu0 %v1156_v35 }
 0xb42   :  { %s4627_s23 = spop %4626 }
 0xb43   :  { %v4135_v28 = vstv %s4627_s23 }
 0xbc5   :  { %v3944_v2 = vpop.xlane.xlu1 %3943 }
 0xbc6   :  { %v3947_v47 = vadd.f32 %v3946_v17, %v3944_v2 }
 0xbc8   :  { %v4112_v3 = vsel %vm4111_vm3, %v3947_v47, 0.0 }
 0xbc9   :  { %v4146_v25 = vpop.xlane.xlu0 %4145 }
 0xbca   :  { %v4147_v20 = vrot.slane %v4146_v25, 4 }
 0xbcc   :  { %v4148_v51 = vmin.f32 %v4146_v25, %v4147_v20 }
 0xbcd   :  { %v1158_v33 = vpop.xlane.xlu0 %1157 }
 0xbce   :  { %v4149_v13 = vrot.slane %v4148_v51, 2  ;;  %v1161_v39 = vadd.f32 %v1160_v38, %v1158_v33 }
 0xbd0   :  { %v4150_v60 = vmin.f32 %v4148_v51, %v4149_v13  ;;  %v4114_v1 = vsel %vm4113_vm4, %v1161_v39, %v4112_v3 }
 0xbd1   :  { %v4136_v14 = vsel %vm4134_vm10, %v4135_v28, %v4114_v1 }
 0xbd2   :  { %v4151_v36 = vrot.slane %v4150_v60, 1 }
 0xbd4   :  { %v4152_v8 = vmin.f32 %v4150_v60, %v4151_v36 }
 0xbd6   :  { %4628 = vpush %v4152_v8 }
 0xc07   :  { %s4629_s24 = spop %4628 }
 0xc08   :  { %v4156_v27 = vstv %s4629_s24 }
 0xc09   :  { %v4157_v31 = vsel %vm4155_vm11, %v4156_v27, %v4136_v14 }
 0xc0a   :  { %4158 = vst [vmem:[%s5806_s16] sm:$0x3] %v4157_v31 }
 0xc0b   :  { %4163 = vsyncpa [#allocation3], 1 }
 0xc0c   :  { %4164 = vsyncpa [#allocation5], 1 }

</bundles_post_ra>
